<compile_context>
chip_gen: v6e
topology: v6e:2x2x1
jax: 0.10.0
libtpu: 0.0.40
codegen_flags: <defaults>
</compile_context>

<pallas_src>
import functools

import jax
import jax.numpy as jnp
from jax.experimental import pallas as pl
from jax.experimental.pallas import tpu as pltpu


def _round_up(x, m):
    return ((x + m - 1) // m) * m


# ----------------------------------------------------------------------------
# Kernel A: sequential LSTM recurrence, time-chunked, batch-block parallel.
# ----------------------------------------------------------------------------
def lstm_recurrent_kernel(hidden_dim, time_chunk,
                          pre_ref, whh_ref, h_out_ref, h_sc, c_sc):
    # pre_ref   : (TT, BB, 4H) x@W_ih + b_ih + b_hh for this time chunk
    # whh_ref   : (H, 4H)      hidden->gate weights (grid-invariant)
    # h_out_ref : (TT, BB, H)  hidden states for this chunk (streams out)
    # h_sc,c_sc : (BB, H)      recurrent state, persists across time chunks
    H = hidden_dim
    tc = pl.program_id(1)          # time-chunk index (inner, "arbitrary")

    @pl.when(tc == 0)
    def _():
        h_sc[...] = jnp.zeros_like(h_sc)
        c_sc[...] = jnp.zeros_like(c_sc)

    whh = whh_ref[...]             # resident for the whole chunk

    def step(tt, carry):
        h, c = carry
        # One fused (BB,H)@(H,4H) MXU matmul for all four gates.
        gates = (pre_ref[tt].astype(jnp.float32)
                 + jnp.dot(h.astype(whh.dtype), whh,
                           preferred_element_type=jnp.float32))
        i_g = jax.nn.sigmoid(gates[:, 0 * H:1 * H])
        f_g = jax.nn.sigmoid(gates[:, 1 * H:2 * H])
        g_g = jnp.tanh(gates[:, 2 * H:3 * H])
        o_g = jax.nn.sigmoid(gates[:, 3 * H:4 * H])
        c_new = f_g * c + i_g * g_g
        h_new = o_g * jnp.tanh(c_new)
        h_out_ref[tt] = h_new
        return h_new, c_new

    h, c = jax.lax.fori_loop(0, time_chunk, step,
                             (h_sc[...], c_sc[...]), unroll=True)
    h_sc[...] = h
    c_sc[...] = c


# ----------------------------------------------------------------------------
# Kernel B: LayerNorm + head projection (weight-resident, lane-dense tiles).
# ----------------------------------------------------------------------------
def ln_head_kernel(h_ref, gamma_ref, beta_ref, w_ref, b_ref, out_ref):
    # h_ref  : (RM, H)   batch-major rows of hidden states
    # gamma/beta : (1, H)
    # w_ref  : (H, VN)   head weight tile (resident across row blocks)
    # b_ref  : (1, VN)
    # out_ref: (RM, VN)
    h = h_ref[...].astype(jnp.float32)
    mu = jnp.mean(h, axis=-1, keepdims=True)
    var = jnp.mean((h - mu) ** 2, axis=-1, keepdims=True)
    ln = (h - mu) * jax.lax.rsqrt(var + 1e-5) * gamma_ref[...] + beta_ref[...]
    out_ref[...] = (jnp.dot(ln.astype(w_ref.dtype), w_ref[...],
                            preferred_element_type=jnp.float32)
                    + b_ref[...])


# ----------------------------------------------------------------------------
# Wrapper helpers
# ----------------------------------------------------------------------------
def _vmem_limit_bytes():
    # 64 MiB physical on v7x, 128 MiB on v5e/v6e; leave headroom.
    try:
        info = pltpu.get_tpu_info()
        return int(info.vmem_capacity_bytes * 3 // 4)
    except Exception:
        return None  # compiler default


def _pick_time_chunk(T, max_tt=32):
    """Largest chunk <= max_tt, preferring an exact divisor of T."""
    if T <= max_tt:
        return T
    best = 1
    for d in range(2, max_tt + 1):
        if T % d == 0:
            best = d
    return best if best >= 8 else 16


def _single_buffered_spec(block_shape, index_map):
    # Grid-invariant weights need no double-buffering; Buffered(1) halves
    # their VMEM footprint.  Fall back if pipeline_mode is unavailable.
    if hasattr(pl, "Buffered"):
        try:
            return pl.BlockSpec(block_shape, index_map,
                                pipeline_mode=pl.Buffered(buffer_count=1))
        except TypeError:
            pass
    return pl.BlockSpec(block_shape, index_map)


# ----------------------------------------------------------------------------
# Forward
# ----------------------------------------------------------------------------
def lstm_baseline_forward(idx, params, *, matmul_dtype=jnp.float32):
    """idx: (B, T) int32 token ids.  Returns logits (B, T, vocab).

    matmul_dtype=jnp.bfloat16 is recommended on v6e/v7x (f32 accumulation is
    kept); the default fp32 path is used for the 1e-3 validation below.
    """
    B, T = idx.shape
    H = params["w_hh"].shape[0]          # w_hh stored as (H, 4H)
    V = params["head_w"].shape[1]        # head_w stored as (H, V)

    vmem_limit = _vmem_limit_bytes()
    hi = jax.lax.Precision.HIGHEST

    # --- glue: embedding gather + hoisted input projection ------------------
    x = params["embedding"][idx].astype(jnp.float32)                    # (B,T,E)
    b_all = (params["b_ih"] + params["b_hh"]).astype(jnp.float32)       # (4H,)
    pre = jnp.einsum("bte,eg->tbg", x, params["w_ih"].astype(jnp.float32),
                     precision=hi) + b_all                              # (T,B,4H)

    # --- pad batch (sublanes) and time (chunking); keep ONE pre-gate tensor -
    if B > 8:
        B_pad = _round_up(B, 16)
        BB = B_pad // 2                  # 2 batch blocks -> both v7x TCs busy
    else:
        B_pad, BB = 8, 8
    NB = B_pad // BB

    TT = _pick_time_chunk(T)
    T_pad = _round_up(T, TT)
    NTC = T_pad // TT

    pre = jnp.pad(pre, ((0, T_pad - T), (0, B_pad - B), (0, 0)))
    pre = pre.astype(matmul_dtype)                                      # (T_pad,B_pad,4H)
    whh = params["w_hh"].astype(matmul_dtype)                           # (H,4H)

    # --- Kernel A: time-chunked recurrence ----------------------------------
    pre_spec = pl.BlockSpec((TT, BB, 4 * H), lambda bb, tc: (tc, bb, 0))
    out_spec = pl.BlockSpec((TT, BB, H), lambda bb, tc: (tc, bb, 0))
    whh_index = lambda bb, tc: (0, 0)

    def run_recurrence(whh_spec):
        return pl.pallas_call(
            functools.partial(lstm_recurrent_kernel, H, TT),
            out_shape=jax.ShapeDtypeStruct((T_pad, B_pad, H), jnp.float32),
            grid=(NB, NTC),
            in_specs=[pre_spec, whh_spec],
            out_specs=out_spec,
            scratch_shapes=[pltpu.VMEM((BB, H), jnp.float32),
                            pltpu.VMEM((BB, H), jnp.float32)],
            compiler_params=pltpu.CompilerParams(
                dimension_semantics=("parallel", "arbitrary"),
                vmem_limit_bytes=vmem_limit),
        )(pre, whh)

    try:
        h_seq = run_recurrence(_single_buffered_spec((H, 4 * H), whh_index))
    except Exception:
        # Buffered(1) not supported on this Pallas build -> default buffering.
        h_seq = run_recurrence(pl.BlockSpec((H, 4 * H), whh_index))

    # --- reorder hidden states batch-major (H-wide tensor, not V-wide) ------
    rows = B * T
    h_rows = jnp.transpose(h_seq[:T, :B, :], (1, 0, 2)).reshape(rows, H)

    # Kernel B tiling: lane-dense vocab tiles (multiple of 128), row blocks
    # that exactly divide the padded row count.
    RM = min(512, _round_up(rows, 8))
    rows_pad = _round_up(rows, RM)
    VN = min(1024, _round_up(V, 128))
    V_pad = _round_up(V, VN)
    NR = rows_pad // RM
    NV = V_pad // VN

    h_rows = jnp.pad(h_rows, ((0, rows_pad - rows), (0, 0))).astype(matmul_dtype)
    gamma = params["ln_gamma"].reshape(1, H).astype(jnp.float32)
    beta = params["ln_beta"].reshape(1, H).astype(jnp.float32)
    hw = jnp.pad(params["head_w"].astype(matmul_dtype), ((0, 0), (0, V_pad - V)))
    hb = jnp.pad(params["head_b"].astype(jnp.float32),
                 (0, V_pad - V)).reshape(1, V_pad)

    # --- Kernel B: vocab-block OUTER / row-block INNER -> head weight tile is
    # fetched once and stays resident while row blocks stream.
    logits_flat = pl.pallas_call(
        ln_head_kernel,
        out_shape=jax.ShapeDtypeStruct((rows_pad, V_pad), jnp.float32),
        grid=(NV, NR),
        in_specs=[
            pl.BlockSpec((RM, H), lambda v, r: (r, 0)),
            pl.BlockSpec((1, H), lambda v, r: (0, 0)),
            pl.BlockSpec((1, H), lambda v, r: (0, 0)),
            pl.BlockSpec((H, VN), lambda v, r: (0, v)),
            pl.BlockSpec((1, VN), lambda v, r: (0, v)),
        ],
        out_specs=pl.BlockSpec((RM, VN), lambda v, r: (r, v)),
        compiler_params=pltpu.CompilerParams(
            dimension_semantics=("parallel", "parallel"),
            vmem_limit_bytes=vmem_limit),
    )(h_rows, gamma, beta, hw, hb)

    # drop padding; rows are already batch-major -> no logits-sized transpose
    return logits_flat[:rows, :V].reshape(B, T, V)


# ----------------------------------------------------------------------------
# Parameters & pure-JAX reference
# ----------------------------------------------------------------------------
def make_params(key, vocab_size, n_embd, hidden_dim):
    ks = jax.random.split(key, 8)
    scale = 0.1
    return {
        "embedding": scale * jax.random.normal(ks[0], (vocab_size, n_embd), jnp.float32),
        # stored pre-transposed relative to PyTorch: (input, 4H) / (H, 4H)
        "w_ih": scale * jax.random.normal(ks[1], (n_embd, 4 * hidden_dim), jnp.float32),
        "w_hh": scale * jax.random.normal(ks[2], (hidden_dim, 4 * hidden_dim), jnp.float32),
        "b_ih": scale * jax.random.normal(ks[3], (4 * hidden_dim,), jnp.float32),
        "b_hh": scale * jax.random.normal(ks[4], (4 * hidden_dim,), jnp.float32),
        "ln_gamma": jnp.ones((hidden_dim,), jnp.float32),
        "ln_beta": jnp.zeros((hidden_dim,), jnp.float32),
        "head_w": scale * jax.random.normal(ks[5], (hidden_dim, vocab_size), jnp.float32),
        "head_b": scale * jax.random.normal(ks[6], (vocab_size,), jnp.float32),
    }


def reference_forward(idx, params):
    """Pure-JAX reference matching the PyTorch forward semantics."""
    hi = jax.lax.Precision.HIGHEST
    x = params["embedding"][idx].astype(jnp.float32)          # (B, T, E)
    B, T, E = x.shape
    H = params["w_hh"].shape[0]
    wih, whh = params["w_ih"], params["w_hh"]
    b = params["b_ih"] + params["b_hh"]

    def step(carry, x_t):
        h, c = carry
        gates = (jnp.dot(x_t, wih, precision=hi)
                 + jnp.dot(h, whh, precision=hi) + b)
        i = jax.nn.sigmoid(gates[:, 0 * H:1 * H])
        f = jax.nn.sigmoid(gates[:, 1 * H:2 * H])
        g = jnp.tanh(gates[:, 2 * H:3 * H])
        o = jax.nn.sigmoid(gates[:, 3 * H:4 * H])
        c = f * c + i * g
        h = o * jnp.tanh(c)
        return (h, c), h

    h0 = jnp.zeros((B, H), jnp.float32)
    c0 = jnp.zeros((B, H), jnp.float32)
    _, hs = jax.lax.scan(step, (h0, c0), jnp.transpose(x, (1, 0, 2)))
    hs = jnp.transpose(hs, (1, 0, 2))                          # (B, T, H)
    mu = jnp.mean(hs, axis=-1, keepdims=True)
    var = jnp.mean((hs - mu) ** 2, axis=-1, keepdims=True)
    ln = (hs - mu) / jnp.sqrt(var + 1e-5) * params["ln_gamma"] + params["ln_beta"]
    return jnp.dot(ln, params["head_w"], precision=hi) + params["head_b"]


if __name__ == "__main__":
    vocab_size, n_embd, block_size, hidden_dim = 64, 32, 8, 32
    B, T = 2, block_size

    key = jax.random.PRNGKey(0)
    pkey, ikey = jax.random.split(key)
    params = make_params(pkey, vocab_size, n_embd, hidden_dim)
    idx = jax.random.randint(ikey, (B, T), 0, vocab_size, dtype=jnp.int32)

    logits = jax.block_until_ready(lstm_baseline_forward(idx, params))
    ref = jax.block_until_ready(reference_forward(idx, params))

    assert logits.shape == (B, T, vocab_size)
    max_err = float(jnp.max(jnp.abs(logits - ref)))
    assert jnp.allclose(logits, ref, atol=1e-3, rtol=1e-3), \
        f"mismatch vs reference (max abs err {max_err})"

    # TODO(synk): cross-entropy loss branch (targets) and generate() sampling
    # loop not ported; forward returns logits only.
    print("KERNEL_OK")
</pallas_src>

<mosaic_0001>
module attributes {stable_mosaic.version = 11 : i64} {
  func.func @lstm_recurrent_kernel(%arg0: i32, %arg1: i32, %arg2: memref<8x8x128xf32, #tpu.memory_space<vmem>>, %arg3: memref<32x128xf32, #tpu.memory_space<vmem>>, %arg4: memref<8x8x32xf32, #tpu.memory_space<vmem>>, %arg5: memref<8x32xf32, #tpu.memory_space<vmem>>, %arg6: memref<8x32xf32, #tpu.memory_space<vmem>>) attributes {dimension_semantics = [#tpu.dimension_semantics<parallel>, #tpu.dimension_semantics<arbitrary>], iteration_bounds = array<i64: 1, 1>, scalar_prefetch = 0 : i64, scratch_operands = 2 : i64, tpu.core_type = #tpu.core_type<tc>, window_params = [{transform_indices = @transform_0, window_bounds = array<i64: 8, 8, 128>}, {pipeline_mode = #tpu.pipeline_mode<synchronous>, transform_indices = @transform_1, window_bounds = array<i64: 32, 128>}, {transform_indices = @transform_2, window_bounds = array<i64: 8, 8, 32>}]} {
    %c0_i32 = arith.constant 0 : i32
    %0 = arith.cmpi eq, %arg1, %c0_i32 : i32
    %1 = arith.extui %0 : i1 to i32
    %c0_i32_0 = arith.constant 0 : i32
    %2 = arith.cmpi ne, %1, %c0_i32_0 : i32
    scf.if %2 {
      %cst_74 = arith.constant 0.000000e+00 : f32
      %280 = vector.broadcast %cst_74 : f32 to vector<8x32xf32>
      %c0_75 = arith.constant 0 : index
      %c0_76 = arith.constant 0 : index
      %281 = vector.load %arg5[%c0_75, %c0_76] : memref<8x32xf32, #tpu.memory_space<vmem>>, vector<8x32xf32>
      tpu.vector_store %arg5[%c0_75, %c0_76], %280 {strides = array<i32>} : memref<8x32xf32, #tpu.memory_space<vmem>>, vector<8x32xf32>,
      %cst_77 = arith.constant 0.000000e+00 : f32
      %282 = vector.broadcast %cst_77 : f32 to vector<8x32xf32>
      %c0_78 = arith.constant 0 : index
      %c0_79 = arith.constant 0 : index
      %283 = vector.load %arg6[%c0_78, %c0_79] : memref<8x32xf32, #tpu.memory_space<vmem>>, vector<8x32xf32>
      tpu.vector_store %arg6[%c0_78, %c0_79], %282 {strides = array<i32>} : memref<8x32xf32, #tpu.memory_space<vmem>>, vector<8x32xf32>,
    } else {
    }
    %c0 = arith.constant 0 : index
    %c0_1 = arith.constant 0 : index
    %3 = vector.load %arg3[%c0, %c0_1] : memref<32x128xf32, #tpu.memory_space<vmem>>, vector<32x128xf32>
    %c0_2 = arith.constant 0 : index
    %c0_3 = arith.constant 0 : index
    %4 = vector.load %arg5[%c0_2, %c0_3] : memref<8x32xf32, #tpu.memory_space<vmem>>, vector<8x32xf32>
    %c0_4 = arith.constant 0 : index
    %c0_5 = arith.constant 0 : index
    %5 = vector.load %arg6[%c0_4, %c0_5] : memref<8x32xf32, #tpu.memory_space<vmem>>, vector<8x32xf32>
    %c0_i32_6 = arith.constant 0 : i32
    %6 = arith.index_cast %c0_i32_6 : i32 to index
    %c0_7 = arith.constant 0 : index
    %c0_8 = arith.constant 0 : index
    %7 = vector.load %arg2[%6, %c0_7, %c0_8] : memref<8x8x128xf32, #tpu.memory_space<vmem>>, vector<1x8x128xf32>
    %8 = vector.shape_cast %7 : vector<1x8x128xf32> to vector<8x128xf32>
    %cst = arith.constant dense<0.000000e+00> : vector<8x128xf32>
    %9 = tpu.matmul %4, %3, %cst {dimension_numbers = #tpu.dot_dimension_numbers<[1], [0], [0], [1], [0, 0, 1, 1], [], []>} : vector<8x32xf32>, vector<32x128xf32>, vector<8x128xf32> -> vector<8x128xf32>
    %10 = arith.addf %8, %9 : vector<8x128xf32>
    %11 = vector.extract_strided_slice %10 {offsets = [0, 0], sizes = [8, 32], strides = [1, 1]} : vector<8x128xf32> to vector<8x32xf32>
    %12 = arith.negf %11 : vector<8x32xf32>
    %13 = math.exp %12 : vector<8x32xf32>
    %cst_9 = arith.constant 1.000000e+00 : f32
    %14 = vector.broadcast %cst_9 : f32 to vector<8x32xf32>
    %15 = arith.addf %14, %13 : vector<8x32xf32>
    %16 = arith.divf %14, %15 : vector<8x32xf32>
    %17 = vector.extract_strided_slice %10 {offsets = [0, 32], sizes = [8, 32], strides = [1, 1]} : vector<8x128xf32> to vector<8x32xf32>
    %18 = arith.negf %17 : vector<8x32xf32>
    %19 = math.exp %18 : vector<8x32xf32>
    %cst_10 = arith.constant 1.000000e+00 : f32
    %20 = vector.broadcast %cst_10 : f32 to vector<8x32xf32>
    %21 = arith.addf %20, %19 : vector<8x32xf32>
    %22 = arith.divf %20, %21 : vector<8x32xf32>
    %23 = vector.extract_strided_slice %10 {offsets = [0, 64], sizes = [8, 32], strides = [1, 1]} : vector<8x128xf32> to vector<8x32xf32>
    %24 = math.tanh %23 : vector<8x32xf32>
    %25 = vector.extract_strided_slice %10 {offsets = [0, 96], sizes = [8, 32], strides = [1, 1]} : vector<8x128xf32> to vector<8x32xf32>
    %26 = arith.negf %25 : vector<8x32xf32>
    %27 = math.exp %26 : vector<8x32xf32>
    %cst_11 = arith.constant 1.000000e+00 : f32
    %28 = vector.broadcast %cst_11 : f32 to vector<8x32xf32>
    %29 = arith.addf %28, %27 : vector<8x32xf32>
    %30 = arith.divf %28, %29 : vector<8x32xf32>
    %31 = arith.mulf %22, %5 : vector<8x32xf32>
    %32 = arith.mulf %16, %24 : vector<8x32xf32>
    %33 = arith.addf %31, %32 : vector<8x32xf32>
    %34 = math.tanh %33 : vector<8x32xf32>
    %35 = arith.mulf %30, %34 : vector<8x32xf32>
    %36 = arith.index_cast %c0_i32_6 : i32 to index
    %c0_12 = arith.constant 0 : index
    %c0_13 = arith.constant 0 : index
    %37 = vector.load %arg4[%36, %c0_12, %c0_13] : memref<8x8x32xf32, #tpu.memory_space<vmem>>, vector<1x8x32xf32>
    %38 = vector.shape_cast %37 : vector<1x8x32xf32> to vector<8x32xf32>
    %39 = vector.shape_cast %35 : vector<8x32xf32> to vector<1x8x32xf32>
    tpu.vector_store %arg4[%36, %c0_12, %c0_13], %39 {strides = array<i32>} : memref<8x8x32xf32, #tpu.memory_space<vmem>>, vector<1x8x32xf32>,
    %c1_i32 = arith.constant 1 : i32
    %40 = arith.index_cast %c1_i32 : i32 to index
    %c0_14 = arith.constant 0 : index
    %c0_15 = arith.constant 0 : index
    %41 = vector.load %arg2[%40, %c0_14, %c0_15] : memref<8x8x128xf32, #tpu.memory_space<vmem>>, vector<1x8x128xf32>
    %42 = vector.shape_cast %41 : vector<1x8x128xf32> to vector<8x128xf32>
    %cst_16 = arith.constant dense<0.000000e+00> : vector<8x128xf32>
    %43 = tpu.matmul %35, %3, %cst_16 {dimension_numbers = #tpu.dot_dimension_numbers<[1], [0], [0], [1], [0, 0, 1, 1], [], []>} : vector<8x32xf32>, vector<32x128xf32>, vector<8x128xf32> -> vector<8x128xf32>
    %44 = arith.addf %42, %43 : vector<8x128xf32>
    %45 = vector.extract_strided_slice %44 {offsets = [0, 0], sizes = [8, 32], strides = [1, 1]} : vector<8x128xf32> to vector<8x32xf32>
    %46 = arith.negf %45 : vector<8x32xf32>
    %47 = math.exp %46 : vector<8x32xf32>
    %cst_17 = arith.constant 1.000000e+00 : f32
    %48 = vector.broadcast %cst_17 : f32 to vector<8x32xf32>
    %49 = arith.addf %48, %47 : vector<8x32xf32>
    %50 = arith.divf %48, %49 : vector<8x32xf32>
    %51 = vector.extract_strided_slice %44 {offsets = [0, 32], sizes = [8, 32], strides = [1, 1]} : vector<8x128xf32> to vector<8x32xf32>
    %52 = arith.negf %51 : vector<8x32xf32>
    %53 = math.exp %52 : vector<8x32xf32>
    %cst_18 = arith.constant 1.000000e+00 : f32
    %54 = vector.broadcast %cst_18 : f32 to vector<8x32xf32>
    %55 = arith.addf %54, %53 : vector<8x32xf32>
    %56 = arith.divf %54, %55 : vector<8x32xf32>
    %57 = vector.extract_strided_slice %44 {offsets = [0, 64], sizes = [8, 32], strides = [1, 1]} : vector<8x128xf32> to vector<8x32xf32>
    %58 = math.tanh %57 : vector<8x32xf32>
    %59 = vector.extract_strided_slice %44 {offsets = [0, 96], sizes = [8, 32], strides = [1, 1]} : vector<8x128xf32> to vector<8x32xf32>
    %60 = arith.negf %59 : vector<8x32xf32>
    %61 = math.exp %60 : vector<8x32xf32>
    %cst_19 = arith.constant 1.000000e+00 : f32
    %62 = vector.broadcast %cst_19 : f32 to vector<8x32xf32>
    %63 = arith.addf %62, %61 : vector<8x32xf32>
    %64 = arith.divf %62, %63 : vector<8x32xf32>
    %65 = arith.mulf %56, %33 : vector<8x32xf32>
    %66 = arith.mulf %50, %58 : vector<8x32xf32>
    %67 = arith.addf %65, %66 : vector<8x32xf32>
    %68 = math.tanh %67 : vector<8x32xf32>
    %69 = arith.mulf %64, %68 : vector<8x32xf32>
    %70 = arith.index_cast %c1_i32 : i32 to index
    %c0_20 = arith.constant 0 : index
    %c0_21 = arith.constant 0 : index
    %71 = vector.load %arg4[%70, %c0_20, %c0_21] : memref<8x8x32xf32, #tpu.memory_space<vmem>>, vector<1x8x32xf32>
    %72 = vector.shape_cast %71 : vector<1x8x32xf32> to vector<8x32xf32>
    %73 = vector.shape_cast %69 : vector<8x32xf32> to vector<1x8x32xf32>
    tpu.vector_store %arg4[%70, %c0_20, %c0_21], %73 {strides = array<i32>} : memref<8x8x32xf32, #tpu.memory_space<vmem>>, vector<1x8x32xf32>,
    %c2_i32 = arith.constant 2 : i32
    %74 = arith.index_cast %c2_i32 : i32 to index
    %c0_22 = arith.constant 0 : index
    %c0_23 = arith.constant 0 : index
    %75 = vector.load %arg2[%74, %c0_22, %c0_23] : memref<8x8x128xf32, #tpu.memory_space<vmem>>, vector<1x8x128xf32>
    %76 = vector.shape_cast %75 : vector<1x8x128xf32> to vector<8x128xf32>
    %cst_24 = arith.constant dense<0.000000e+00> : vector<8x128xf32>
    %77 = tpu.matmul %69, %3, %cst_24 {dimension_numbers = #tpu.dot_dimension_numbers<[1], [0], [0], [1], [0, 0, 1, 1], [], []>} : vector<8x32xf32>, vector<32x128xf32>, vector<8x128xf32> -> vector<8x128xf32>
    %78 = arith.addf %76, %77 : vector<8x128xf32>
    %79 = vector.extract_strided_slice %78 {offsets = [0, 0], sizes = [8, 32], strides = [1, 1]} : vector<8x128xf32> to vector<8x32xf32>
    %80 = arith.negf %79 : vector<8x32xf32>
    %81 = math.exp %80 : vector<8x32xf32>
    %cst_25 = arith.constant 1.000000e+00 : f32
    %82 = vector.broadcast %cst_25 : f32 to vector<8x32xf32>
    %83 = arith.addf %82, %81 : vector<8x32xf32>
    %84 = arith.divf %82, %83 : vector<8x32xf32>
    %85 = vector.extract_strided_slice %78 {offsets = [0, 32], sizes = [8, 32], strides = [1, 1]} : vector<8x128xf32> to vector<8x32xf32>
    %86 = arith.negf %85 : vector<8x32xf32>
    %87 = math.exp %86 : vector<8x32xf32>
    %cst_26 = arith.constant 1.000000e+00 : f32
    %88 = vector.broadcast %cst_26 : f32 to vector<8x32xf32>
    %89 = arith.addf %88, %87 : vector<8x32xf32>
    %90 = arith.divf %88, %89 : vector<8x32xf32>
    %91 = vector.extract_strided_slice %78 {offsets = [0, 64], sizes = [8, 32], strides = [1, 1]} : vector<8x128xf32> to vector<8x32xf32>
    %92 = math.tanh %91 : vector<8x32xf32>
    %93 = vector.extract_strided_slice %78 {offsets = [0, 96], sizes = [8, 32], strides = [1, 1]} : vector<8x128xf32> to vector<8x32xf32>
    %94 = arith.negf %93 : vector<8x32xf32>
    %95 = math.exp %94 : vector<8x32xf32>
    %cst_27 = arith.constant 1.000000e+00 : f32
    %96 = vector.broadcast %cst_27 : f32 to vector<8x32xf32>
    %97 = arith.addf %96, %95 : vector<8x32xf32>
    %98 = arith.divf %96, %97 : vector<8x32xf32>
    %99 = arith.mulf %90, %67 : vector<8x32xf32>
    %100 = arith.mulf %84, %92 : vector<8x32xf32>
    %101 = arith.addf %99, %100 : vector<8x32xf32>
    %102 = math.tanh %101 : vector<8x32xf32>
    %103 = arith.mulf %98, %102 : vector<8x32xf32>
    %104 = arith.index_cast %c2_i32 : i32 to index
    %c0_28 = arith.constant 0 : index
    %c0_29 = arith.constant 0 : index
    %105 = vector.load %arg4[%104, %c0_28, %c0_29] : memref<8x8x32xf32, #tpu.memory_space<vmem>>, vector<1x8x32xf32>
    %106 = vector.shape_cast %105 : vector<1x8x32xf32> to vector<8x32xf32>
    %107 = vector.shape_cast %103 : vector<8x32xf32> to vector<1x8x32xf32>
    tpu.vector_store %arg4[%104, %c0_28, %c0_29], %107 {strides = array<i32>} : memref<8x8x32xf32, #tpu.memory_space<vmem>>, vector<1x8x32xf32>,
    %c3_i32 = arith.constant 3 : i32
    %108 = arith.index_cast %c3_i32 : i32 to index
    %c0_30 = arith.constant 0 : index
    %c0_31 = arith.constant 0 : index
    %109 = vector.load %arg2[%108, %c0_30, %c0_31] : memref<8x8x128xf32, #tpu.memory_space<vmem>>, vector<1x8x128xf32>
    %110 = vector.shape_cast %109 : vector<1x8x128xf32> to vector<8x128xf32>
    %cst_32 = arith.constant dense<0.000000e+00> : vector<8x128xf32>
    %111 = tpu.matmul %103, %3, %cst_32 {dimension_numbers = #tpu.dot_dimension_numbers<[1], [0], [0], [1], [0, 0, 1, 1], [], []>} : vector<8x32xf32>, vector<32x128xf32>, vector<8x128xf32> -> vector<8x128xf32>
    %112 = arith.addf %110, %111 : vector<8x128xf32>
    %113 = vector.extract_strided_slice %112 {offsets = [0, 0], sizes = [8, 32], strides = [1, 1]} : vector<8x128xf32> to vector<8x32xf32>
    %114 = arith.negf %113 : vector<8x32xf32>
    %115 = math.exp %114 : vector<8x32xf32>
    %cst_33 = arith.constant 1.000000e+00 : f32
    %116 = vector.broadcast %cst_33 : f32 to vector<8x32xf32>
    %117 = arith.addf %116, %115 : vector<8x32xf32>
    %118 = arith.divf %116, %117 : vector<8x32xf32>
    %119 = vector.extract_strided_slice %112 {offsets = [0, 32], sizes = [8, 32], strides = [1, 1]} : vector<8x128xf32> to vector<8x32xf32>
    %120 = arith.negf %119 : vector<8x32xf32>
    %121 = math.exp %120 : vector<8x32xf32>
    %cst_34 = arith.constant 1.000000e+00 : f32
    %122 = vector.broadcast %cst_34 : f32 to vector<8x32xf32>
    %123 = arith.addf %122, %121 : vector<8x32xf32>
    %124 = arith.divf %122, %123 : vector<8x32xf32>
    %125 = vector.extract_strided_slice %112 {offsets = [0, 64], sizes = [8, 32], strides = [1, 1]} : vector<8x128xf32> to vector<8x32xf32>
    %126 = math.tanh %125 : vector<8x32xf32>
    %127 = vector.extract_strided_slice %112 {offsets = [0, 96], sizes = [8, 32], strides = [1, 1]} : vector<8x128xf32> to vector<8x32xf32>
    %128 = arith.negf %127 : vector<8x32xf32>
    %129 = math.exp %128 : vector<8x32xf32>
    %cst_35 = arith.constant 1.000000e+00 : f32
    %130 = vector.broadcast %cst_35 : f32 to vector<8x32xf32>
    %131 = arith.addf %130, %129 : vector<8x32xf32>
    %132 = arith.divf %130, %131 : vector<8x32xf32>
    %133 = arith.mulf %124, %101 : vector<8x32xf32>
    %134 = arith.mulf %118, %126 : vector<8x32xf32>
    %135 = arith.addf %133, %134 : vector<8x32xf32>
    %136 = math.tanh %135 : vector<8x32xf32>
    %137 = arith.mulf %132, %136 : vector<8x32xf32>
    %138 = arith.index_cast %c3_i32 : i32 to index
    %c0_36 = arith.constant 0 : index
    %c0_37 = arith.constant 0 : index
    %139 = vector.load %arg4[%138, %c0_36, %c0_37] : memref<8x8x32xf32, #tpu.memory_space<vmem>>, vector<1x8x32xf32>
    %140 = vector.shape_cast %139 : vector<1x8x32xf32> to vector<8x32xf32>
    %141 = vector.shape_cast %137 : vector<8x32xf32> to vector<1x8x32xf32>
    tpu.vector_store %arg4[%138, %c0_36, %c0_37], %141 {strides = array<i32>} : memref<8x8x32xf32, #tpu.memory_space<vmem>>, vector<1x8x32xf32>,
    %c4_i32 = arith.constant 4 : i32
    %142 = arith.index_cast %c4_i32 : i32 to index
    %c0_38 = arith.constant 0 : index
    %c0_39 = arith.constant 0 : index
    %143 = vector.load %arg2[%142, %c0_38, %c0_39] : memref<8x8x128xf32, #tpu.memory_space<vmem>>, vector<1x8x128xf32>
    %144 = vector.shape_cast %143 : vector<1x8x128xf32> to vector<8x128xf32>
    %cst_40 = arith.constant dense<0.000000e+00> : vector<8x128xf32>
    %145 = tpu.matmul %137, %3, %cst_40 {dimension_numbers = #tpu.dot_dimension_numbers<[1], [0], [0], [1], [0, 0, 1, 1], [], []>} : vector<8x32xf32>, vector<32x128xf32>, vector<8x128xf32> -> vector<8x128xf32>
    %146 = arith.addf %144, %145 : vector<8x128xf32>
    %147 = vector.extract_strided_slice %146 {offsets = [0, 0], sizes = [8, 32], strides = [1, 1]} : vector<8x128xf32> to vector<8x32xf32>
    %148 = arith.negf %147 : vector<8x32xf32>
    %149 = math.exp %148 : vector<8x32xf32>
    %cst_41 = arith.constant 1.000000e+00 : f32
    %150 = vector.broadcast %cst_41 : f32 to vector<8x32xf32>
    %151 = arith.addf %150, %149 : vector<8x32xf32>
    %152 = arith.divf %150, %151 : vector<8x32xf32>
    %153 = vector.extract_strided_slice %146 {offsets = [0, 32], sizes = [8, 32], strides = [1, 1]} : vector<8x128xf32> to vector<8x32xf32>
    %154 = arith.negf %153 : vector<8x32xf32>
    %155 = math.exp %154 : vector<8x32xf32>
    %cst_42 = arith.constant 1.000000e+00 : f32
    %156 = vector.broadcast %cst_42 : f32 to vector<8x32xf32>
    %157 = arith.addf %156, %155 : vector<8x32xf32>
    %158 = arith.divf %156, %157 : vector<8x32xf32>
    %159 = vector.extract_strided_slice %146 {offsets = [0, 64], sizes = [8, 32], strides = [1, 1]} : vector<8x128xf32> to vector<8x32xf32>
    %160 = math.tanh %159 : vector<8x32xf32>
    %161 = vector.extract_strided_slice %146 {offsets = [0, 96], sizes = [8, 32], strides = [1, 1]} : vector<8x128xf32> to vector<8x32xf32>
    %162 = arith.negf %161 : vector<8x32xf32>
    %163 = math.exp %162 : vector<8x32xf32>
    %cst_43 = arith.constant 1.000000e+00 : f32
    %164 = vector.broadcast %cst_43 : f32 to vector<8x32xf32>
    %165 = arith.addf %164, %163 : vector<8x32xf32>
    %166 = arith.divf %164, %165 : vector<8x32xf32>
    %167 = arith.mulf %158, %135 : vector<8x32xf32>
    %168 = arith.mulf %152, %160 : vector<8x32xf32>
    %169 = arith.addf %167, %168 : vector<8x32xf32>
    %170 = math.tanh %169 : vector<8x32xf32>
    %171 = arith.mulf %166, %170 : vector<8x32xf32>
    %172 = arith.index_cast %c4_i32 : i32 to index
    %c0_44 = arith.constant 0 : index
    %c0_45 = arith.constant 0 : index
    %173 = vector.load %arg4[%172, %c0_44, %c0_45] : memref<8x8x32xf32, #tpu.memory_space<vmem>>, vector<1x8x32xf32>
    %174 = vector.shape_cast %173 : vector<1x8x32xf32> to vector<8x32xf32>
    %175 = vector.shape_cast %171 : vector<8x32xf32> to vector<1x8x32xf32>
    tpu.vector_store %arg4[%172, %c0_44, %c0_45], %175 {strides = array<i32>} : memref<8x8x32xf32, #tpu.memory_space<vmem>>, vector<1x8x32xf32>,
    %c5_i32 = arith.constant 5 : i32
    %176 = arith.index_cast %c5_i32 : i32 to index
    %c0_46 = arith.constant 0 : index
    %c0_47 = arith.constant 0 : index
    %177 = vector.load %arg2[%176, %c0_46, %c0_47] : memref<8x8x128xf32, #tpu.memory_space<vmem>>, vector<1x8x128xf32>
    %178 = vector.shape_cast %177 : vector<1x8x128xf32> to vector<8x128xf32>
    %cst_48 = arith.constant dense<0.000000e+00> : vector<8x128xf32>
    %179 = tpu.matmul %171, %3, %cst_48 {dimension_numbers = #tpu.dot_dimension_numbers<[1], [0], [0], [1], [0, 0, 1, 1], [], []>} : vector<8x32xf32>, vector<32x128xf32>, vector<8x128xf32> -> vector<8x128xf32>
    %180 = arith.addf %178, %179 : vector<8x128xf32>
    %181 = vector.extract_strided_slice %180 {offsets = [0, 0], sizes = [8, 32], strides = [1, 1]} : vector<8x128xf32> to vector<8x32xf32>
    %182 = arith.negf %181 : vector<8x32xf32>
    %183 = math.exp %182 : vector<8x32xf32>
    %cst_49 = arith.constant 1.000000e+00 : f32
    %184 = vector.broadcast %cst_49 : f32 to vector<8x32xf32>
    %185 = arith.addf %184, %183 : vector<8x32xf32>
    %186 = arith.divf %184, %185 : vector<8x32xf32>
    %187 = vector.extract_strided_slice %180 {offsets = [0, 32], sizes = [8, 32], strides = [1, 1]} : vector<8x128xf32> to vector<8x32xf32>
    %188 = arith.negf %187 : vector<8x32xf32>
    %189 = math.exp %188 : vector<8x32xf32>
    %cst_50 = arith.constant 1.000000e+00 : f32
    %190 = vector.broadcast %cst_50 : f32 to vector<8x32xf32>
    %191 = arith.addf %190, %189 : vector<8x32xf32>
    %192 = arith.divf %190, %191 : vector<8x32xf32>
    %193 = vector.extract_strided_slice %180 {offsets = [0, 64], sizes = [8, 32], strides = [1, 1]} : vector<8x128xf32> to vector<8x32xf32>
    %194 = math.tanh %193 : vector<8x32xf32>
    %195 = vector.extract_strided_slice %180 {offsets = [0, 96], sizes = [8, 32], strides = [1, 1]} : vector<8x128xf32> to vector<8x32xf32>
    %196 = arith.negf %195 : vector<8x32xf32>
    %197 = math.exp %196 : vector<8x32xf32>
    %cst_51 = arith.constant 1.000000e+00 : f32
    %198 = vector.broadcast %cst_51 : f32 to vector<8x32xf32>
    %199 = arith.addf %198, %197 : vector<8x32xf32>
    %200 = arith.divf %198, %199 : vector<8x32xf32>
    %201 = arith.mulf %192, %169 : vector<8x32xf32>
    %202 = arith.mulf %186, %194 : vector<8x32xf32>
    %203 = arith.addf %201, %202 : vector<8x32xf32>
    %204 = math.tanh %203 : vector<8x32xf32>
    %205 = arith.mulf %200, %204 : vector<8x32xf32>
    %206 = arith.index_cast %c5_i32 : i32 to index
    %c0_52 = arith.constant 0 : index
    %c0_53 = arith.constant 0 : index
    %207 = vector.load %arg4[%206, %c0_52, %c0_53] : memref<8x8x32xf32, #tpu.memory_space<vmem>>, vector<1x8x32xf32>
    %208 = vector.shape_cast %207 : vector<1x8x32xf32> to vector<8x32xf32>
    %209 = vector.shape_cast %205 : vector<8x32xf32> to vector<1x8x32xf32>
    tpu.vector_store %arg4[%206, %c0_52, %c0_53], %209 {strides = array<i32>} : memref<8x8x32xf32, #tpu.memory_space<vmem>>, vector<1x8x32xf32>,
    %c6_i32 = arith.constant 6 : i32
    %210 = arith.index_cast %c6_i32 : i32 to index
    %c0_54 = arith.constant 0 : index
    %c0_55 = arith.constant 0 : index
    %211 = vector.load %arg2[%210, %c0_54, %c0_55] : memref<8x8x128xf32, #tpu.memory_space<vmem>>, vector<1x8x128xf32>
    %212 = vector.shape_cast %211 : vector<1x8x128xf32> to vector<8x128xf32>
    %cst_56 = arith.constant dense<0.000000e+00> : vector<8x128xf32>
    %213 = tpu.matmul %205, %3, %cst_56 {dimension_numbers = #tpu.dot_dimension_numbers<[1], [0], [0], [1], [0, 0, 1, 1], [], []>} : vector<8x32xf32>, vector<32x128xf32>, vector<8x128xf32> -> vector<8x128xf32>
    %214 = arith.addf %212, %213 : vector<8x128xf32>
    %215 = vector.extract_strided_slice %214 {offsets = [0, 0], sizes = [8, 32], strides = [1, 1]} : vector<8x128xf32> to vector<8x32xf32>
    %216 = arith.negf %215 : vector<8x32xf32>
    %217 = math.exp %216 : vector<8x32xf32>
    %cst_57 = arith.constant 1.000000e+00 : f32
    %218 = vector.broadcast %cst_57 : f32 to vector<8x32xf32>
    %219 = arith.addf %218, %217 : vector<8x32xf32>
    %220 = arith.divf %218, %219 : vector<8x32xf32>
    %221 = vector.extract_strided_slice %214 {offsets = [0, 32], sizes = [8, 32], strides = [1, 1]} : vector<8x128xf32> to vector<8x32xf32>
    %222 = arith.negf %221 : vector<8x32xf32>
    %223 = math.exp %222 : vector<8x32xf32>
    %cst_58 = arith.constant 1.000000e+00 : f32
    %224 = vector.broadcast %cst_58 : f32 to vector<8x32xf32>
    %225 = arith.addf %224, %223 : vector<8x32xf32>
    %226 = arith.divf %224, %225 : vector<8x32xf32>
    %227 = vector.extract_strided_slice %214 {offsets = [0, 64], sizes = [8, 32], strides = [1, 1]} : vector<8x128xf32> to vector<8x32xf32>
    %228 = math.tanh %227 : vector<8x32xf32>
    %229 = vector.extract_strided_slice %214 {offsets = [0, 96], sizes = [8, 32], strides = [1, 1]} : vector<8x128xf32> to vector<8x32xf32>
    %230 = arith.negf %229 : vector<8x32xf32>
    %231 = math.exp %230 : vector<8x32xf32>
    %cst_59 = arith.constant 1.000000e+00 : f32
    %232 = vector.broadcast %cst_59 : f32 to vector<8x32xf32>
    %233 = arith.addf %232, %231 : vector<8x32xf32>
    %234 = arith.divf %232, %233 : vector<8x32xf32>
    %235 = arith.mulf %226, %203 : vector<8x32xf32>
    %236 = arith.mulf %220, %228 : vector<8x32xf32>
    %237 = arith.addf %235, %236 : vector<8x32xf32>
    %238 = math.tanh %237 : vector<8x32xf32>
    %239 = arith.mulf %234, %238 : vector<8x32xf32>
    %240 = arith.index_cast %c6_i32 : i32 to index
    %c0_60 = arith.constant 0 : index
    %c0_61 = arith.constant 0 : index
    %241 = vector.load %arg4[%240, %c0_60, %c0_61] : memref<8x8x32xf32, #tpu.memory_space<vmem>>, vector<1x8x32xf32>
    %242 = vector.shape_cast %241 : vector<1x8x32xf32> to vector<8x32xf32>
    %243 = vector.shape_cast %239 : vector<8x32xf32> to vector<1x8x32xf32>
    tpu.vector_store %arg4[%240, %c0_60, %c0_61], %243 {strides = array<i32>} : memref<8x8x32xf32, #tpu.memory_space<vmem>>, vector<1x8x32xf32>,
    %c7_i32 = arith.constant 7 : i32
    %244 = arith.index_cast %c7_i32 : i32 to index
    %c0_62 = arith.constant 0 : index
    %c0_63 = arith.constant 0 : index
    %245 = vector.load %arg2[%244, %c0_62, %c0_63] : memref<8x8x128xf32, #tpu.memory_space<vmem>>, vector<1x8x128xf32>
    %246 = vector.shape_cast %245 : vector<1x8x128xf32> to vector<8x128xf32>
    %cst_64 = arith.constant dense<0.000000e+00> : vector<8x128xf32>
    %247 = tpu.matmul %239, %3, %cst_64 {dimension_numbers = #tpu.dot_dimension_numbers<[1], [0], [0], [1], [0, 0, 1, 1], [], []>} : vector<8x32xf32>, vector<32x128xf32>, vector<8x128xf32> -> vector<8x128xf32>
    %248 = arith.addf %246, %247 : vector<8x128xf32>
    %249 = vector.extract_strided_slice %248 {offsets = [0, 0], sizes = [8, 32], strides = [1, 1]} : vector<8x128xf32> to vector<8x32xf32>
    %250 = arith.negf %249 : vector<8x32xf32>
    %251 = math.exp %250 : vector<8x32xf32>
    %cst_65 = arith.constant 1.000000e+00 : f32
    %252 = vector.broadcast %cst_65 : f32 to vector<8x32xf32>
    %253 = arith.addf %252, %251 : vector<8x32xf32>
    %254 = arith.divf %252, %253 : vector<8x32xf32>
    %255 = vector.extract_strided_slice %248 {offsets = [0, 32], sizes = [8, 32], strides = [1, 1]} : vector<8x128xf32> to vector<8x32xf32>
    %256 = arith.negf %255 : vector<8x32xf32>
    %257 = math.exp %256 : vector<8x32xf32>
    %cst_66 = arith.constant 1.000000e+00 : f32
    %258 = vector.broadcast %cst_66 : f32 to vector<8x32xf32>
    %259 = arith.addf %258, %257 : vector<8x32xf32>
    %260 = arith.divf %258, %259 : vector<8x32xf32>
    %261 = vector.extract_strided_slice %248 {offsets = [0, 64], sizes = [8, 32], strides = [1, 1]} : vector<8x128xf32> to vector<8x32xf32>
    %262 = math.tanh %261 : vector<8x32xf32>
    %263 = vector.extract_strided_slice %248 {offsets = [0, 96], sizes = [8, 32], strides = [1, 1]} : vector<8x128xf32> to vector<8x32xf32>
    %264 = arith.negf %263 : vector<8x32xf32>
    %265 = math.exp %264 : vector<8x32xf32>
    %cst_67 = arith.constant 1.000000e+00 : f32
    %266 = vector.broadcast %cst_67 : f32 to vector<8x32xf32>
    %267 = arith.addf %266, %265 : vector<8x32xf32>
    %268 = arith.divf %266, %267 : vector<8x32xf32>
    %269 = arith.mulf %260, %237 : vector<8x32xf32>
    %270 = arith.mulf %254, %262 : vector<8x32xf32>
    %271 = arith.addf %269, %270 : vector<8x32xf32>
    %272 = math.tanh %271 : vector<8x32xf32>
    %273 = arith.mulf %268, %272 : vector<8x32xf32>
    %274 = arith.index_cast %c7_i32 : i32 to index
    %c0_68 = arith.constant 0 : index
    %c0_69 = arith.constant 0 : index
    %275 = vector.load %arg4[%274, %c0_68, %c0_69] : memref<8x8x32xf32, #tpu.memory_space<vmem>>, vector<1x8x32xf32>
    %276 = vector.shape_cast %275 : vector<1x8x32xf32> to vector<8x32xf32>
    %277 = vector.shape_cast %273 : vector<8x32xf32> to vector<1x8x32xf32>
    tpu.vector_store %arg4[%274, %c0_68, %c0_69], %277 {strides = array<i32>} : memref<8x8x32xf32, #tpu.memory_space<vmem>>, vector<1x8x32xf32>,
    %c8_i32 = arith.constant 8 : i32
    %c0_70 = arith.constant 0 : index
    %c0_71 = arith.constant 0 : index
    %278 = vector.load %arg5[%c0_70, %c0_71] : memref<8x32xf32, #tpu.memory_space<vmem>>, vector<8x32xf32>
    tpu.vector_store %arg5[%c0_70, %c0_71], %273 {strides = array<i32>} : memref<8x32xf32, #tpu.memory_space<vmem>>, vector<8x32xf32>,
    %c0_72 = arith.constant 0 : index
    %c0_73 = arith.constant 0 : index
    %279 = vector.load %arg6[%c0_72, %c0_73] : memref<8x32xf32, #tpu.memory_space<vmem>>, vector<8x32xf32>
    tpu.vector_store %arg6[%c0_72, %c0_73], %271 {strides = array<i32>} : memref<8x32xf32, #tpu.memory_space<vmem>>, vector<8x32xf32>,
    return
  }
  func.func @transform_0(%arg0: i32, %arg1: i32) -> (i32, i32, i32) {
    %c0_i32 = arith.constant 0 : i32
    %c0_i32_0 = arith.constant 0 : i32
    return %arg1, %arg0, %c0_i32 : i32, i32, i32
  }
  func.func @transform_1(%arg0: i32, %arg1: i32) -> (i32, i32) {
    %c0_i32 = arith.constant 0 : i32
    %c0_i32_0 = arith.constant 0 : i32
    %c0_i32_1 = arith.constant 0 : i32
    return %c0_i32, %c0_i32_0 : i32, i32
  }
  func.func @transform_2(%arg0: i32, %arg1: i32) -> (i32, i32, i32) {
    %c0_i32 = arith.constant 0 : i32
    %c0_i32_0 = arith.constant 0 : i32
    return %arg1, %arg0, %c0_i32 : i32, i32, i32
  }
}

module attributes {stable_mosaic.version = 11 : i64} {
  func.func @lstm_recurrent_kernel(%arg0: i32, %arg1: i32, %arg2: memref<8x8x128xf32, #tpu.memory_space<vmem>>, %arg3: memref<32x128xf32, #tpu.memory_space<vmem>>, %arg4: memref<8x8x32xf32, #tpu.memory_space<vmem>>, %arg5: memref<8x32xf32, #tpu.memory_space<vmem>>, %arg6: memref<8x32xf32, #tpu.memory_space<vmem>>) attributes {dimension_semantics = [#tpu.dimension_semantics<parallel>, #tpu.dimension_semantics<arbitrary>], iteration_bounds = array<i64: 1, 1>, scalar_prefetch = 0 : i64, scratch_operands = 2 : i64, tpu.core_type = #tpu.core_type<tc>, window_params = [{transform_indices = @transform_0, window_bounds = array<i64: 8, 8, 128>}, {pipeline_mode = #tpu.pipeline_mode<synchronous>, transform_indices = @transform_1, window_bounds = array<i64: 32, 128>}, {transform_indices = @transform_2, window_bounds = array<i64: 8, 8, 32>}]} {
    %c0_i32 = arith.constant 0 : i32
    %0 = arith.cmpi eq, %arg1, %c0_i32 : i32
    %1 = arith.extui %0 : i1 to i32
    %c0_i32_0 = arith.constant 0 : i32
    %2 = arith.cmpi ne, %1, %c0_i32_0 : i32
    scf.if %2 {
      %cst_74 = arith.constant 0.000000e+00 : f32
      %280 = vector.broadcast %cst_74 : f32 to vector<8x32xf32>
      %c0_75 = arith.constant 0 : index
      %c0_76 = arith.constant 0 : index
      %281 = vector.load %arg5[%c0_75, %c0_76] : memref<8x32xf32, #tpu.memory_space<vmem>>, vector<8x32xf32>
      tpu.vector_store %arg5[%c0_75, %c0_76], %280 {strides = array<i32>} : memref<8x32xf32, #tpu.memory_space<vmem>>, vector<8x32xf32>,
      %cst_77 = arith.constant 0.000000e+00 : f32
      %282 = vector.broadcast %cst_77 : f32 to vector<8x32xf32>
      %c0_78 = arith.constant 0 : index
      %c0_79 = arith.constant 0 : index
      %283 = vector.load %arg6[%c0_78, %c0_79] : memref<8x32xf32, #tpu.memory_space<vmem>>, vector<8x32xf32>
      tpu.vector_store %arg6[%c0_78, %c0_79], %282 {strides = array<i32>} : memref<8x32xf32, #tpu.memory_space<vmem>>, vector<8x32xf32>,
    } else {
    }
    %c0 = arith.constant 0 : index
    %c0_1 = arith.constant 0 : index
    %3 = vector.load %arg3[%c0, %c0_1] : memref<32x128xf32, #tpu.memory_space<vmem>>, vector<32x128xf32>
    %c0_2 = arith.constant 0 : index
    %c0_3 = arith.constant 0 : index
    %4 = vector.load %arg5[%c0_2, %c0_3] : memref<8x32xf32, #tpu.memory_space<vmem>>, vector<8x32xf32>
    %c0_4 = arith.constant 0 : index
    %c0_5 = arith.constant 0 : index
    %5 = vector.load %arg6[%c0_4, %c0_5] : memref<8x32xf32, #tpu.memory_space<vmem>>, vector<8x32xf32>
    %c0_i32_6 = arith.constant 0 : i32
    %6 = arith.index_cast %c0_i32_6 : i32 to index
    %c0_7 = arith.constant 0 : index
    %c0_8 = arith.constant 0 : index
    %7 = vector.load %arg2[%6, %c0_7, %c0_8] : memref<8x8x128xf32, #tpu.memory_space<vmem>>, vector<1x8x128xf32>
    %8 = vector.shape_cast %7 : vector<1x8x128xf32> to vector<8x128xf32>
    %cst = arith.constant dense<0.000000e+00> : vector<8x128xf32>
    %9 = tpu.matmul %4, %3, %cst {dimension_numbers = #tpu.dot_dimension_numbers<[1], [0], [0], [1], [0, 0, 1, 1], [], []>} : vector<8x32xf32>, vector<32x128xf32>, vector<8x128xf32> -> vector<8x128xf32>
    %10 = arith.addf %8, %9 : vector<8x128xf32>
    %11 = vector.extract_strided_slice %10 {offsets = [0, 0], sizes = [8, 32], strides = [1, 1]} : vector<8x128xf32> to vector<8x32xf32>
    %12 = arith.negf %11 : vector<8x32xf32>
    %13 = math.exp %12 : vector<8x32xf32>
    %cst_9 = arith.constant 1.000000e+00 : f32
    %14 = vector.broadcast %cst_9 : f32 to vector<8x32xf32>
    %15 = arith.addf %14, %13 : vector<8x32xf32>
    %16 = arith.divf %14, %15 : vector<8x32xf32>
    %17 = vector.extract_strided_slice %10 {offsets = [0, 32], sizes = [8, 32], strides = [1, 1]} : vector<8x128xf32> to vector<8x32xf32>
    %18 = arith.negf %17 : vector<8x32xf32>
    %19 = math.exp %18 : vector<8x32xf32>
    %cst_10 = arith.constant 1.000000e+00 : f32
    %20 = vector.broadcast %cst_10 : f32 to vector<8x32xf32>
    %21 = arith.addf %20, %19 : vector<8x32xf32>
    %22 = arith.divf %20, %21 : vector<8x32xf32>
    %23 = vector.extract_strided_slice %10 {offsets = [0, 64], sizes = [8, 32], strides = [1, 1]} : vector<8x128xf32> to vector<8x32xf32>
    %24 = math.tanh %23 : vector<8x32xf32>
    %25 = vector.extract_strided_slice %10 {offsets = [0, 96], sizes = [8, 32], strides = [1, 1]} : vector<8x128xf32> to vector<8x32xf32>
    %26 = arith.negf %25 : vector<8x32xf32>
    %27 = math.exp %26 : vector<8x32xf32>
    %cst_11 = arith.constant 1.000000e+00 : f32
    %28 = vector.broadcast %cst_11 : f32 to vector<8x32xf32>
    %29 = arith.addf %28, %27 : vector<8x32xf32>
    %30 = arith.divf %28, %29 : vector<8x32xf32>
    %31 = arith.mulf %22, %5 : vector<8x32xf32>
    %32 = arith.mulf %16, %24 : vector<8x32xf32>
    %33 = arith.addf %31, %32 : vector<8x32xf32>
    %34 = math.tanh %33 : vector<8x32xf32>
    %35 = arith.mulf %30, %34 : vector<8x32xf32>
    %36 = arith.index_cast %c0_i32_6 : i32 to index
    %c0_12 = arith.constant 0 : index
    %c0_13 = arith.constant 0 : index
    %37 = vector.load %arg4[%36, %c0_12, %c0_13] : memref<8x8x32xf32, #tpu.memory_space<vmem>>, vector<1x8x32xf32>
    %38 = vector.shape_cast %37 : vector<1x8x32xf32> to vector<8x32xf32>
    %39 = vector.shape_cast %35 : vector<8x32xf32> to vector<1x8x32xf32>
    tpu.vector_store %arg4[%36, %c0_12, %c0_13], %39 {strides = array<i32>} : memref<8x8x32xf32, #tpu.memory_space<vmem>>, vector<1x8x32xf32>,
    %c1_i32 = arith.constant 1 : i32
    %40 = arith.index_cast %c1_i32 : i32 to index
    %c0_14 = arith.constant 0 : index
    %c0_15 = arith.constant 0 : index
    %41 = vector.load %arg2[%40, %c0_14, %c0_15] : memref<8x8x128xf32, #tpu.memory_space<vmem>>, vector<1x8x128xf32>
    %42 = vector.shape_cast %41 : vector<1x8x128xf32> to vector<8x128xf32>
    %cst_16 = arith.constant dense<0.000000e+00> : vector<8x128xf32>
    %43 = tpu.matmul %35, %3, %cst_16 {dimension_numbers = #tpu.dot_dimension_numbers<[1], [0], [0], [1], [0, 0, 1, 1], [], []>} : vector<8x32xf32>, vector<32x128xf32>, vector<8x128xf32> -> vector<8x128xf32>
    %44 = arith.addf %42, %43 : vector<8x128xf32>
    %45 = vector.extract_strided_slice %44 {offsets = [0, 0], sizes = [8, 32], strides = [1, 1]} : vector<8x128xf32> to vector<8x32xf32>
    %46 = arith.negf %45 : vector<8x32xf32>
    %47 = math.exp %46 : vector<8x32xf32>
    %cst_17 = arith.constant 1.000000e+00 : f32
    %48 = vector.broadcast %cst_17 : f32 to vector<8x32xf32>
    %49 = arith.addf %48, %47 : vector<8x32xf32>
    %50 = arith.divf %48, %49 : vector<8x32xf32>
    %51 = vector.extract_strided_slice %44 {offsets = [0, 32], sizes = [8, 32], strides = [1, 1]} : vector<8x128xf32> to vector<8x32xf32>
    %52 = arith.negf %51 : vector<8x32xf32>
    %53 = math.exp %52 : vector<8x32xf32>
    %cst_18 = arith.constant 1.000000e+00 : f32
    %54 = vector.broadcast %cst_18 : f32 to vector<8x32xf32>
    %55 = arith.addf %54, %53 : vector<8x32xf32>
    %56 = arith.divf %54, %55 : vector<8x32xf32>
    %57 = vector.extract_strided_slice %44 {offsets = [0, 64], sizes = [8, 32], strides = [1, 1]} : vector<8x128xf32> to vector<8x32xf32>
    %58 = math.tanh %57 : vector<8x32xf32>
    %59 = vector.extract_strided_slice %44 {offsets = [0, 96], sizes = [8, 32], strides = [1, 1]} : vector<8x128xf32> to vector<8x32xf32>
    %60 = arith.negf %59 : vector<8x32xf32>
    %61 = math.exp %60 : vector<8x32xf32>
    %cst_19 = arith.constant 1.000000e+00 : f32
    %62 = vector.broadcast %cst_19 : f32 to vector<8x32xf32>
    %63 = arith.addf %62, %61 : vector<8x32xf32>
    %64 = arith.divf %62, %63 : vector<8x32xf32>
    %65 = arith.mulf %56, %33 : vector<8x32xf32>
    %66 = arith.mulf %50, %58 : vector<8x32xf32>
    %67 = arith.addf %65, %66 : vector<8x32xf32>
    %68 = math.tanh %67 : vector<8x32xf32>
    %69 = arith.mulf %64, %68 : vector<8x32xf32>
    %70 = arith.index_cast %c1_i32 : i32 to index
    %c0_20 = arith.constant 0 : index
    %c0_21 = arith.constant 0 : index
    %71 = vector.load %arg4[%70, %c0_20, %c0_21] : memref<8x8x32xf32, #tpu.memory_space<vmem>>, vector<1x8x32xf32>
    %72 = vector.shape_cast %71 : vector<1x8x32xf32> to vector<8x32xf32>
    %73 = vector.shape_cast %69 : vector<8x32xf32> to vector<1x8x32xf32>
    tpu.vector_store %arg4[%70, %c0_20, %c0_21], %73 {strides = array<i32>} : memref<8x8x32xf32, #tpu.memory_space<vmem>>, vector<1x8x32xf32>,
    %c2_i32 = arith.constant 2 : i32
    %74 = arith.index_cast %c2_i32 : i32 to index
    %c0_22 = arith.constant 0 : index
    %c0_23 = arith.constant 0 : index
    %75 = vector.load %arg2[%74, %c0_22, %c0_23] : memref<8x8x128xf32, #tpu.memory_space<vmem>>, vector<1x8x128xf32>
    %76 = vector.shape_cast %75 : vector<1x8x128xf32> to vector<8x128xf32>
    %cst_24 = arith.constant dense<0.000000e+00> : vector<8x128xf32>
    %77 = tpu.matmul %69, %3, %cst_24 {dimension_numbers = #tpu.dot_dimension_numbers<[1], [0], [0], [1], [0, 0, 1, 1], [], []>} : vector<8x32xf32>, vector<32x128xf32>, vector<8x128xf32> -> vector<8x128xf32>
    %78 = arith.addf %76, %77 : vector<8x128xf32>
    %79 = vector.extract_strided_slice %78 {offsets = [0, 0], sizes = [8, 32], strides = [1, 1]} : vector<8x128xf32> to vector<8x32xf32>
    %80 = arith.negf %79 : vector<8x32xf32>
    %81 = math.exp %80 : vector<8x32xf32>
    %cst_25 = arith.constant 1.000000e+00 : f32
    %82 = vector.broadcast %cst_25 : f32 to vector<8x32xf32>
    %83 = arith.addf %82, %81 : vector<8x32xf32>
    %84 = arith.divf %82, %83 : vector<8x32xf32>
    %85 = vector.extract_strided_slice %78 {offsets = [0, 32], sizes = [8, 32], strides = [1, 1]} : vector<8x128xf32> to vector<8x32xf32>
    %86 = arith.negf %85 : vector<8x32xf32>
    %87 = math.exp %86 : vector<8x32xf32>
    %cst_26 = arith.constant 1.000000e+00 : f32
    %88 = vector.broadcast %cst_26 : f32 to vector<8x32xf32>
    %89 = arith.addf %88, %87 : vector<8x32xf32>
    %90 = arith.divf %88, %89 : vector<8x32xf32>
    %91 = vector.extract_strided_slice %78 {offsets = [0, 64], sizes = [8, 32], strides = [1, 1]} : vector<8x128xf32> to vector<8x32xf32>
    %92 = math.tanh %91 : vector<8x32xf32>
    %93 = vector.extract_strided_slice %78 {offsets = [0, 96], sizes = [8, 32], strides = [1, 1]} : vector<8x128xf32> to vector<8x32xf32>
    %94 = arith.negf %93 : vector<8x32xf32>
    %95 = math.exp %94 : vector<8x32xf32>
    %cst_27 = arith.constant 1.000000e+00 : f32
    %96 = vector.broadcast %cst_27 : f32 to vector<8x32xf32>
    %97 = arith.addf %96, %95 : vector<8x32xf32>
    %98 = arith.divf %96, %97 : vector<8x32xf32>
    %99 = arith.mulf %90, %67 : vector<8x32xf32>
    %100 = arith.mulf %84, %92 : vector<8x32xf32>
    %101 = arith.addf %99, %100 : vector<8x32xf32>
    %102 = math.tanh %101 : vector<8x32xf32>
    %103 = arith.mulf %98, %102 : vector<8x32xf32>
    %104 = arith.index_cast %c2_i32 : i32 to index
    %c0_28 = arith.constant 0 : index
    %c0_29 = arith.constant 0 : index
    %105 = vector.load %arg4[%104, %c0_28, %c0_29] : memref<8x8x32xf32, #tpu.memory_space<vmem>>, vector<1x8x32xf32>
    %106 = vector.shape_cast %105 : vector<1x8x32xf32> to vector<8x32xf32>
    %107 = vector.shape_cast %103 : vector<8x32xf32> to vector<1x8x32xf32>
    tpu.vector_store %arg4[%104, %c0_28, %c0_29], %107 {strides = array<i32>} : memref<8x8x32xf32, #tpu.memory_space<vmem>>, vector<1x8x32xf32>,
    %c3_i32 = arith.constant 3 : i32
    %108 = arith.index_cast %c3_i32 : i32 to index
    %c0_30 = arith.constant 0 : index
    %c0_31 = arith.constant 0 : index
    %109 = vector.load %arg2[%108, %c0_30, %c0_31] : memref<8x8x128xf32, #tpu.memory_space<vmem>>, vector<1x8x128xf32>
    %110 = vector.shape_cast %109 : vector<1x8x128xf32> to vector<8x128xf32>
    %cst_32 = arith.constant dense<0.000000e+00> : vector<8x128xf32>
    %111 = tpu.matmul %103, %3, %cst_32 {dimension_numbers = #tpu.dot_dimension_numbers<[1], [0], [0], [1], [0, 0, 1, 1], [], []>} : vector<8x32xf32>, vector<32x128xf32>, vector<8x128xf32> -> vector<8x128xf32>
    %112 = arith.addf %110, %111 : vector<8x128xf32>
    %113 = vector.extract_strided_slice %112 {offsets = [0, 0], sizes = [8, 32], strides = [1, 1]} : vector<8x128xf32> to vector<8x32xf32>
    %114 = arith.negf %113 : vector<8x32xf32>
    %115 = math.exp %114 : vector<8x32xf32>
    %cst_33 = arith.constant 1.000000e+00 : f32
    %116 = vector.broadcast %cst_33 : f32 to vector<8x32xf32>
    %117 = arith.addf %116, %115 : vector<8x32xf32>
    %118 = arith.divf %116, %117 : vector<8x32xf32>
    %119 = vector.extract_strided_slice %112 {offsets = [0, 32], sizes = [8, 32], strides = [1, 1]} : vector<8x128xf32> to vector<8x32xf32>
    %120 = arith.negf %119 : vector<8x32xf32>
    %121 = math.exp %120 : vector<8x32xf32>
    %cst_34 = arith.constant 1.000000e+00 : f32
    %122 = vector.broadcast %cst_34 : f32 to vector<8x32xf32>
    %123 = arith.addf %122, %121 : vector<8x32xf32>
    %124 = arith.divf %122, %123 : vector<8x32xf32>
    %125 = vector.extract_strided_slice %112 {offsets = [0, 64], sizes = [8, 32], strides = [1, 1]} : vector<8x128xf32> to vector<8x32xf32>
    %126 = math.tanh %125 : vector<8x32xf32>
    %127 = vector.extract_strided_slice %112 {offsets = [0, 96], sizes = [8, 32], strides = [1, 1]} : vector<8x128xf32> to vector<8x32xf32>
    %128 = arith.negf %127 : vector<8x32xf32>
    %129 = math.exp %128 : vector<8x32xf32>
    %cst_35 = arith.constant 1.000000e+00 : f32
    %130 = vector.broadcast %cst_35 : f32 to vector<8x32xf32>
    %131 = arith.addf %130, %129 : vector<8x32xf32>
    %132 = arith.divf %130, %131 : vector<8x32xf32>
    %133 = arith.mulf %124, %101 : vector<8x32xf32>
    %134 = arith.mulf %118, %126 : vector<8x32xf32>
    %135 = arith.addf %133, %134 : vector<8x32xf32>
    %136 = math.tanh %135 : vector<8x32xf32>
    %137 = arith.mulf %132, %136 : vector<8x32xf32>
    %138 = arith.index_cast %c3_i32 : i32 to index
    %c0_36 = arith.constant 0 : index
    %c0_37 = arith.constant 0 : index
    %139 = vector.load %arg4[%138, %c0_36, %c0_37] : memref<8x8x32xf32, #tpu.memory_space<vmem>>, vector<1x8x32xf32>
    %140 = vector.shape_cast %139 : vector<1x8x32xf32> to vector<8x32xf32>
    %141 = vector.shape_cast %137 : vector<8x32xf32> to vector<1x8x32xf32>
    tpu.vector_store %arg4[%138, %c0_36, %c0_37], %141 {strides = array<i32>} : memref<8x8x32xf32, #tpu.memory_space<vmem>>, vector<1x8x32xf32>,
    %c4_i32 = arith.constant 4 : i32
    %142 = arith.index_cast %c4_i32 : i32 to index
    %c0_38 = arith.constant 0 : index
    %c0_39 = arith.constant 0 : index
    %143 = vector.load %arg2[%142, %c0_38, %c0_39] : memref<8x8x128xf32, #tpu.memory_space<vmem>>, vector<1x8x128xf32>
    %144 = vector.shape_cast %143 : vector<1x8x128xf32> to vector<8x128xf32>
    %cst_40 = arith.constant dense<0.000000e+00> : vector<8x128xf32>
    %145 = tpu.matmul %137, %3, %cst_40 {dimension_numbers = #tpu.dot_dimension_numbers<[1], [0], [0], [1], [0, 0, 1, 1], [], []>} : vector<8x32xf32>, vector<32x128xf32>, vector<8x128xf32> -> vector<8x128xf32>
    %146 = arith.addf %144, %145 : vector<8x128xf32>
    %147 = vector.extract_strided_slice %146 {offsets = [0, 0], sizes = [8, 32], strides = [1, 1]} : vector<8x128xf32> to vector<8x32xf32>
    %148 = arith.negf %147 : vector<8x32xf32>
    %149 = math.exp %148 : vector<8x32xf32>
    %cst_41 = arith.constant 1.000000e+00 : f32
    %150 = vector.broadcast %cst_41 : f32 to vector<8x32xf32>
    %151 = arith.addf %150, %149 : vector<8x32xf32>
    %152 = arith.divf %150, %151 : vector<8x32xf32>
    %153 = vector.extract_strided_slice %146 {offsets = [0, 32], sizes = [8, 32], strides = [1, 1]} : vector<8x128xf32> to vector<8x32xf32>
    %154 = arith.negf %153 : vector<8x32xf32>
    %155 = math.exp %154 : vector<8x32xf32>
    %cst_42 = arith.constant 1.000000e+00 : f32
    %156 = vector.broadcast %cst_42 : f32 to vector<8x32xf32>
    %157 = arith.addf %156, %155 : vector<8x32xf32>
    %158 = arith.divf %156, %157 : vector<8x32xf32>
    %159 = vector.extract_strided_slice %146 {offsets = [0, 64], sizes = [8, 32], strides = [1, 1]} : vector<8x128xf32> to vector<8x32xf32>
    %160 = math.tanh %159 : vector<8x32xf32>
    %161 = vector.extract_strided_slice %146 {offsets = [0, 96], sizes = [8, 32], strides = [1, 1]} : vector<8x128xf32> to vector<8x32xf32>
    %162 = arith.negf %161 : vector<8x32xf32>
    %163 = math.exp %162 : vector<8x32xf32>
    %cst_43 = arith.constant 1.000000e+00 : f32
    %164 = vector.broadcast %cst_43 : f32 to vector<8x32xf32>
    %165 = arith.addf %164, %163 : vector<8x32xf32>
    %166 = arith.divf %164, %165 : vector<8x32xf32>
    %167 = arith.mulf %158, %135 : vector<8x32xf32>
    %168 = arith.mulf %152, %160 : vector<8x32xf32>
    %169 = arith.addf %167, %168 : vector<8x32xf32>
    %170 = math.tanh %169 : vector<8x32xf32>
    %171 = arith.mulf %166, %170 : vector<8x32xf32>
    %172 = arith.index_cast %c4_i32 : i32 to index
    %c0_44 = arith.constant 0 : index
    %c0_45 = arith.constant 0 : index
    %173 = vector.load %arg4[%172, %c0_44, %c0_45] : memref<8x8x32xf32, #tpu.memory_space<vmem>>, vector<1x8x32xf32>
    %174 = vector.shape_cast %173 : vector<1x8x32xf32> to vector<8x32xf32>
    %175 = vector.shape_cast %171 : vector<8x32xf32> to vector<1x8x32xf32>
    tpu.vector_store %arg4[%172, %c0_44, %c0_45], %175 {strides = array<i32>} : memref<8x8x32xf32, #tpu.memory_space<vmem>>, vector<1x8x32xf32>,
    %c5_i32 = arith.constant 5 : i32
    %176 = arith.index_cast %c5_i32 : i32 to index
    %c0_46 = arith.constant 0 : index
    %c0_47 = arith.constant 0 : index
    %177 = vector.load %arg2[%176, %c0_46, %c0_47] : memref<8x8x128xf32, #tpu.memory_space<vmem>>, vector<1x8x128xf32>
    %178 = vector.shape_cast %177 : vector<1x8x128xf32> to vector<8x128xf32>
    %cst_48 = arith.constant dense<0.000000e+00> : vector<8x128xf32>
    %179 = tpu.matmul %171, %3, %cst_48 {dimension_numbers = #tpu.dot_dimension_numbers<[1], [0], [0], [1], [0, 0, 1, 1], [], []>} : vector<8x32xf32>, vector<32x128xf32>, vector<8x128xf32> -> vector<8x128xf32>
    %180 = arith.addf %178, %179 : vector<8x128xf32>
    %181 = vector.extract_strided_slice %180 {offsets = [0, 0], sizes = [8, 32], strides = [1, 1]} : vector<8x128xf32> to vector<8x32xf32>
    %182 = arith.negf %181 : vector<8x32xf32>
    %183 = math.exp %182 : vector<8x32xf32>
    %cst_49 = arith.constant 1.000000e+00 : f32
    %184 = vector.broadcast %cst_49 : f32 to vector<8x32xf32>
    %185 = arith.addf %184, %183 : vector<8x32xf32>
    %186 = arith.divf %184, %185 : vector<8x32xf32>
    %187 = vector.extract_strided_slice %180 {offsets = [0, 32], sizes = [8, 32], strides = [1, 1]} : vector<8x128xf32> to vector<8x32xf32>
    %188 = arith.negf %187 : vector<8x32xf32>
    %189 = math.exp %188 : vector<8x32xf32>
    %cst_50 = arith.constant 1.000000e+00 : f32
    %190 = vector.broadcast %cst_50 : f32 to vector<8x32xf32>
    %191 = arith.addf %190, %189 : vector<8x32xf32>
    %192 = arith.divf %190, %191 : vector<8x32xf32>
    %193 = vector.extract_strided_slice %180 {offsets = [0, 64], sizes = [8, 32], strides = [1, 1]} : vector<8x128xf32> to vector<8x32xf32>
    %194 = math.tanh %193 : vector<8x32xf32>
    %195 = vector.extract_strided_slice %180 {offsets = [0, 96], sizes = [8, 32], strides = [1, 1]} : vector<8x128xf32> to vector<8x32xf32>
    %196 = arith.negf %195 : vector<8x32xf32>
    %197 = math.exp %196 : vector<8x32xf32>
    %cst_51 = arith.constant 1.000000e+00 : f32
    %198 = vector.broadcast %cst_51 : f32 to vector<8x32xf32>
    %199 = arith.addf %198, %197 : vector<8x32xf32>
    %200 = arith.divf %198, %199 : vector<8x32xf32>
    %201 = arith.mulf %192, %169 : vector<8x32xf32>
    %202 = arith.mulf %186, %194 : vector<8x32xf32>
    %203 = arith.addf %201, %202 : vector<8x32xf32>
    %204 = math.tanh %203 : vector<8x32xf32>
    %205 = arith.mulf %200, %204 : vector<8x32xf32>
    %206 = arith.index_cast %c5_i32 : i32 to index
    %c0_52 = arith.constant 0 : index
    %c0_53 = arith.constant 0 : index
    %207 = vector.load %arg4[%206, %c0_52, %c0_53] : memref<8x8x32xf32, #tpu.memory_space<vmem>>, vector<1x8x32xf32>
    %208 = vector.shape_cast %207 : vector<1x8x32xf32> to vector<8x32xf32>
    %209 = vector.shape_cast %205 : vector<8x32xf32> to vector<1x8x32xf32>
    tpu.vector_store %arg4[%206, %c0_52, %c0_53], %209 {strides = array<i32>} : memref<8x8x32xf32, #tpu.memory_space<vmem>>, vector<1x8x32xf32>,
    %c6_i32 = arith.constant 6 : i32
    %210 = arith.index_cast %c6_i32 : i32 to index
    %c0_54 = arith.constant 0 : index
    %c0_55 = arith.constant 0 : index
    %211 = vector.load %arg2[%210, %c0_54, %c0_55] : memref<8x8x128xf32, #tpu.memory_space<vmem>>, vector<1x8x128xf32>
    %212 = vector.shape_cast %211 : vector<1x8x128xf32> to vector<8x128xf32>
    %cst_56 = arith.constant dense<0.000000e+00> : vector<8x128xf32>
    %213 = tpu.matmul %205, %3, %cst_56 {dimension_numbers = #tpu.dot_dimension_numbers<[1], [0], [0], [1], [0, 0, 1, 1], [], []>} : vector<8x32xf32>, vector<32x128xf32>, vector<8x128xf32> -> vector<8x128xf32>
    %214 = arith.addf %212, %213 : vector<8x128xf32>
    %215 = vector.extract_strided_slice %214 {offsets = [0, 0], sizes = [8, 32], strides = [1, 1]} : vector<8x128xf32> to vector<8x32xf32>
    %216 = arith.negf %215 : vector<8x32xf32>
    %217 = math.exp %216 : vector<8x32xf32>
    %cst_57 = arith.constant 1.000000e+00 : f32
    %218 = vector.broadcast %cst_57 : f32 to vector<8x32xf32>
    %219 = arith.addf %218, %217 : vector<8x32xf32>
    %220 = arith.divf %218, %219 : vector<8x32xf32>
    %221 = vector.extract_strided_slice %214 {offsets = [0, 32], sizes = [8, 32], strides = [1, 1]} : vector<8x128xf32> to vector<8x32xf32>
    %222 = arith.negf %221 : vector<8x32xf32>
    %223 = math.exp %222 : vector<8x32xf32>
    %cst_58 = arith.constant 1.000000e+00 : f32
    %224 = vector.broadcast %cst_58 : f32 to vector<8x32xf32>
    %225 = arith.addf %224, %223 : vector<8x32xf32>
    %226 = arith.divf %224, %225 : vector<8x32xf32>
    %227 = vector.extract_strided_slice %214 {offsets = [0, 64], sizes = [8, 32], strides = [1, 1]} : vector<8x128xf32> to vector<8x32xf32>
    %228 = math.tanh %227 : vector<8x32xf32>
    %229 = vector.extract_strided_slice %214 {offsets = [0, 96], sizes = [8, 32], strides = [1, 1]} : vector<8x128xf32> to vector<8x32xf32>
    %230 = arith.negf %229 : vector<8x32xf32>
    %231 = math.exp %230 : vector<8x32xf32>
    %cst_59 = arith.constant 1.000000e+00 : f32
    %232 = vector.broadcast %cst_59 : f32 to vector<8x32xf32>
    %233 = arith.addf %232, %231 : vector<8x32xf32>
    %234 = arith.divf %232, %233 : vector<8x32xf32>
    %235 = arith.mulf %226, %203 : vector<8x32xf32>
    %236 = arith.mulf %220, %228 : vector<8x32xf32>
    %237 = arith.addf %235, %236 : vector<8x32xf32>
    %238 = math.tanh %237 : vector<8x32xf32>
    %239 = arith.mulf %234, %238 : vector<8x32xf32>
    %240 = arith.index_cast %c6_i32 : i32 to index
    %c0_60 = arith.constant 0 : index
    %c0_61 = arith.constant 0 : index
    %241 = vector.load %arg4[%240, %c0_60, %c0_61] : memref<8x8x32xf32, #tpu.memory_space<vmem>>, vector<1x8x32xf32>
    %242 = vector.shape_cast %241 : vector<1x8x32xf32> to vector<8x32xf32>
    %243 = vector.shape_cast %239 : vector<8x32xf32> to vector<1x8x32xf32>
    tpu.vector_store %arg4[%240, %c0_60, %c0_61], %243 {strides = array<i32>} : memref<8x8x32xf32, #tpu.memory_space<vmem>>, vector<1x8x32xf32>,
    %c7_i32 = arith.constant 7 : i32
    %244 = arith.index_cast %c7_i32 : i32 to index
    %c0_62 = arith.constant 0 : index
    %c0_63 = arith.constant 0 : index
    %245 = vector.load %arg2[%244, %c0_62, %c0_63] : memref<8x8x128xf32, #tpu.memory_space<vmem>>, vector<1x8x128xf32>
    %246 = vector.shape_cast %245 : vector<1x8x128xf32> to vector<8x128xf32>
    %cst_64 = arith.constant dense<0.000000e+00> : vector<8x128xf32>
    %247 = tpu.matmul %239, %3, %cst_64 {dimension_numbers = #tpu.dot_dimension_numbers<[1], [0], [0], [1], [0, 0, 1, 1], [], []>} : vector<8x32xf32>, vector<32x128xf32>, vector<8x128xf32> -> vector<8x128xf32>
    %248 = arith.addf %246, %247 : vector<8x128xf32>
    %249 = vector.extract_strided_slice %248 {offsets = [0, 0], sizes = [8, 32], strides = [1, 1]} : vector<8x128xf32> to vector<8x32xf32>
    %250 = arith.negf %249 : vector<8x32xf32>
    %251 = math.exp %250 : vector<8x32xf32>
    %cst_65 = arith.constant 1.000000e+00 : f32
    %252 = vector.broadcast %cst_65 : f32 to vector<8x32xf32>
    %253 = arith.addf %252, %251 : vector<8x32xf32>
    %254 = arith.divf %252, %253 : vector<8x32xf32>
    %255 = vector.extract_strided_slice %248 {offsets = [0, 32], sizes = [8, 32], strides = [1, 1]} : vector<8x128xf32> to vector<8x32xf32>
    %256 = arith.negf %255 : vector<8x32xf32>
    %257 = math.exp %256 : vector<8x32xf32>
    %cst_66 = arith.constant 1.000000e+00 : f32
    %258 = vector.broadcast %cst_66 : f32 to vector<8x32xf32>
    %259 = arith.addf %258, %257 : vector<8x32xf32>
    %260 = arith.divf %258, %259 : vector<8x32xf32>
    %261 = vector.extract_strided_slice %248 {offsets = [0, 64], sizes = [8, 32], strides = [1, 1]} : vector<8x128xf32> to vector<8x32xf32>
    %262 = math.tanh %261 : vector<8x32xf32>
    %263 = vector.extract_strided_slice %248 {offsets = [0, 96], sizes = [8, 32], strides = [1, 1]} : vector<8x128xf32> to vector<8x32xf32>
    %264 = arith.negf %263 : vector<8x32xf32>
    %265 = math.exp %264 : vector<8x32xf32>
    %cst_67 = arith.constant 1.000000e+00 : f32
    %266 = vector.broadcast %cst_67 : f32 to vector<8x32xf32>
    %267 = arith.addf %266, %265 : vector<8x32xf32>
    %268 = arith.divf %266, %267 : vector<8x32xf32>
    %269 = arith.mulf %260, %237 : vector<8x32xf32>
    %270 = arith.mulf %254, %262 : vector<8x32xf32>
    %271 = arith.addf %269, %270 : vector<8x32xf32>
    %272 = math.tanh %271 : vector<8x32xf32>
    %273 = arith.mulf %268, %272 : vector<8x32xf32>
    %274 = arith.index_cast %c7_i32 : i32 to index
    %c0_68 = arith.constant 0 : index
    %c0_69 = arith.constant 0 : index
    %275 = vector.load %arg4[%274, %c0_68, %c0_69] : memref<8x8x32xf32, #tpu.memory_space<vmem>>, vector<1x8x32xf32>
    %276 = vector.shape_cast %275 : vector<1x8x32xf32> to vector<8x32xf32>
    %277 = vector.shape_cast %273 : vector<8x32xf32> to vector<1x8x32xf32>
    tpu.vector_store %arg4[%274, %c0_68, %c0_69], %277 {strides = array<i32>} : memref<8x8x32xf32, #tpu.memory_space<vmem>>, vector<1x8x32xf32>,
    %c8_i32 = arith.constant 8 : i32
    %c0_70 = arith.constant 0 : index
    %c0_71 = arith.constant 0 : index
    %278 = vector.load %arg5[%c0_70, %c0_71] : memref<8x32xf32, #tpu.memory_space<vmem>>, vector<8x32xf32>
    tpu.vector_store %arg5[%c0_70, %c0_71], %273 {strides = array<i32>} : memref<8x32xf32, #tpu.memory_space<vmem>>, vector<8x32xf32>,
    %c0_72 = arith.constant 0 : index
    %c0_73 = arith.constant 0 : index
    %279 = vector.load %arg6[%c0_72, %c0_73] : memref<8x32xf32, #tpu.memory_space<vmem>>, vector<8x32xf32>
    tpu.vector_store %arg6[%c0_72, %c0_73], %271 {strides = array<i32>} : memref<8x32xf32, #tpu.memory_space<vmem>>, vector<8x32xf32>,
    return
  }
  func.func @transform_0(%arg0: i32, %arg1: i32) -> (i32, i32, i32) {
    %c0_i32 = arith.constant 0 : i32
    %c0_i32_0 = arith.constant 0 : i32
    return %arg1, %arg0, %c0_i32 : i32, i32, i32
  }
  func.func @transform_1(%arg0: i32, %arg1: i32) -> (i32, i32) {
    %c0_i32 = arith.constant 0 : i32
    %c0_i32_0 = arith.constant 0 : i32
    %c0_i32_1 = arith.constant 0 : i32
    return %c0_i32, %c0_i32_0 : i32, i32
  }
  func.func @transform_2(%arg0: i32, %arg1: i32) -> (i32, i32, i32) {
    %c0_i32 = arith.constant 0 : i32
    %c0_i32_0 = arith.constant 0 : i32
    return %arg1, %arg0, %c0_i32 : i32, i32, i32
  }
}

</mosaic_0001>

<bundles_post_ra>
// kernel: tpu_custom_call.1
= control target key start
LH: loop header
LB: loop body
LE: loop exit
PB: predicated region body
PF: predicated region fallthrough
CT: control target
= control target key end

     0   :  { %7 = vsyncpa [#allocation5], 0  ;;  %s1391_s0 = inlined_call_operand.hbm [shape: f32[8,8,128], index: 0, kind: input, shape index: {}]   ;;  %s1392_s1 = inlined_call_operand.hbm [shape: f32[32,128], index: 1, kind: input, shape index: {}]   ;;  %s1393_s2 = inlined_call_operand.hbm [shape: f32[8,8,32], index: 2, kind: output, shape index: {}]  }
   0x1   :  { %8 = vsyncpa [#allocation8], 0 }
   0x2   :  { %9 = vsyncpa [#allocation6], 0  ;;  %s1205_s9 = smov [#allocation4]  }
   0x3   :  { %s15_s10 = sshll.u32 %s1205_s9, 4  ;;  %s16_s10 = int_to_ptr.vmem [resolvable:$true] %s15_s10 }
   0x4   :  { %s1147_s11 = scalar_lea.vmem %s16_s10, 1024  ;;  %p1152_p1 = scmp.lt.s32.totalorder %s16_s10, %s16_s10 }
   0x5   :  { %p1148_p0 = scmp.ne.s32.totalorder %s16_s10, %s1147_s11  ;;  %p1153_p2 = scmp.lt.s32.totalorder %s1147_s11, %s1147_s11 }
   0x7   :  { %p1154_p3 = por %p1153_p2, %p1152_p1 }
   0x9   :  { %p1155_p4 = pnand %p1154_p3, %p1148_p0 }
   0xb   :  { %1158 = shalt.err (!%p1155_p4)
}
   0xc   :  { %s1206_s12 = smov 128   ;;  %s1207_s13 = smov 8  }
   0xd   :  { %21 = dma.hbm_to_vmem [thread:$0]  %s1391_s0, 1024, %s16_s10, [#allocation5], %s1206_s12, %s1206_s12, %s1207_s13  }
   0xe   :  { %s1208_s16 = smov [#allocation7]  }
   0xf   :  { %s27_s17 = sshll.u32 %s1208_s16, 4  ;;  %s28_s17 = int_to_ptr.vmem [resolvable:$true] %s27_s17 }
  0x10   :  { %s1167_s18 = scalar_lea.vmem %s28_s17, 512  ;;  %p1172_p6 = scmp.lt.s32.totalorder %s28_s17, %s28_s17 }
  0x11   :  { %p1168_p5 = scmp.ne.s32.totalorder %s28_s17, %s1167_s18  ;;  %p1173_p7 = scmp.lt.s32.totalorder %s1167_s18, %s1167_s18 }
  0x13   :  { %p1174_p8 = por %p1173_p7, %p1172_p6 }
  0x15   :  { %p1175_p9 = pnand %p1174_p8, %p1168_p5 }
  0x17   :  { %1178 = shalt.err (!%p1175_p9)
}
  0x18   :  { %33 = dma.hbm_to_vmem [thread:$0]  %s1392_s1, 512, %s28_s17, [#allocation8], %s1206_s12, %s1206_s12, %s1207_s13  }
  0x19   :  { %1199 = dma.done.wait [#allocation5], 1024  }
  0x1a   :  { %1200 = vsyncadd [#allocation5], 4294966272 }
  0x1b   :  { %1201 = dma.done.wait [#allocation8], 512  }
  0x1c   :  { %1202 = vsyncadd [#allocation8], 4294966784  ;;  %vm44_vm0 = vcmask 261120   ;;  %v1209_v0 = vmov 0.0   ;;  %vm1210_vm1 = vmmov 0   ;;  %v1252_v1 = vld [vmem:[#allocation7 + $0x18] sm:$0xff] }
  0x1d   :  { %977 = vmatprep.subr.mxu0 %v1209_v0  ;;  %985 = vmatprep.mubr.msk.f32.mxu0 %vm1210_vm1, %v1209_v0  ;;  %45 = vst.msk [vmem:[#allocation2] sm:$0xff] %vm44_vm0, %v1209_v0  ;;  %46 = vst.msk [vmem:[#allocation3] sm:$0xff] %vm44_vm0, %v1209_v0  ;;  %v1254_v2 = vld [vmem:[#allocation7 + $0x10] sm:$0xff]  ;;  %v1259_v3 = vld [vmem:[#allocation7 + $0x8] sm:$0xff]  ;;  %s1211_s0 = smov 64   ;;  %s1212_s1 = smov 32  }
  0x1e   :  { %988 = vmatprep.subr.mxu1 %v1209_v0  ;;  %996 = vmatprep.mubr.msk.f32.mxu1 %vm1210_vm1, %v1209_v0  ;;  %v1265_v4 = vld [vmem:[#allocation7] sm:$0xff]  ;;  %v163_v26 = vld [vmem:[#allocation4 + $0x8] sm:$0xff]  ;;  %v268_v44 = vld [vmem:[#allocation4 + $0x10] sm:$0xff]  ;;  %s1213_s21 = smov 96   ;;  %s1214_s22 = smov [#allocation9]  }
  0x1f   :  { %978 = vmatpush3.msra.mxu0 %v1252_v1  ;;  %989 = vmatpush3.msra.mxu1 %v1252_v1  ;;  %v53_v6 = vld [vmem:[#allocation4] sm:$0xff]  ;;  %v373_v62 = vld [vmem:[#allocation4 + $0x18] sm:$0xff]  ;;  %s908_s23 = sshll.u32 %s1214_s22, 4  ;;  %s909_s23 = int_to_ptr.vmem [resolvable:$true] %s908_s23 }
  0x20   :  { %979 = vmatprep.subr.mxu0 %v1209_v0  ;;  %990 = vmatprep.subr.mxu1 %v1209_v0  ;;  %s1179_s24 = scalar_lea.vmem %s909_s23, 1024  ;;  %p1184_p11 = scmp.lt.s32.totalorder %s909_s23, %s909_s23 }
  0x21   :  { %980 = vmatpush3.msra.mxu0 %v1254_v2  ;;  %991 = vmatpush3.msra.mxu1 %v1254_v2  ;;  %p1180_p10 = scmp.ne.s32.totalorder %s909_s23, %s1179_s24  ;;  %p1185_p12 = scmp.lt.s32.totalorder %s1179_s24, %s1179_s24 }
  0x22   :  { %981 = vmatprep.subr.mxu0 %v1209_v0  ;;  %992 = vmatprep.subr.mxu1 %v1209_v0 }
  0x23   :  { %982 = vmatpush3.msra.mxu0 %v1259_v3  ;;  %993 = vmatpush3.msra.mxu1 %v1259_v3  ;;  %p1186_p13 = por %p1185_p12, %p1184_p11 }
  0x24   :  { %v51_v5 = vld [vmem:[#allocation2] sm:$0xff]  ;;  %983 = vmatprep.subr.mxu0 %v1209_v0  ;;  %994 = vmatprep.subr.mxu1 %v1209_v0  ;;  %v52_v11 = vld [vmem:[#allocation3] sm:$0xff] }
  0x25   :  { %984 = vmatpush3.msra.mxu0 %v1265_v4  ;;  %995 = vmatpush3.msra.mxu1 %v1265_v4  ;;  %p1187_p0 = pnand %p1186_p13, %p1180_p10 }
  0x26   :  { %986 = vmatmul.mubr.msk.f32.vlgmr.msra.gmra.mxu0 %vm44_vm0, %v51_v5  ;;  %999 = vmatprep.subr.mxu0 %v1209_v0 }
  0x27   :  { %1000 = vmatpush3.msra.mxu0 %v1252_v1  ;;  %1007 = vmatprep.mubr.msk.f32.mxu0 %vm1210_vm1, %v1209_v0 }
  0x28   :  { %1001 = vmatprep.subr.mxu0 %v1209_v0  ;;  %1010 = vmatprep.subr.mxu1 %v1209_v0 }
  0x29   :  { %1002 = vmatpush3.msra.mxu0 %v1254_v2 }
  0x2a   :  { %1003 = vmatprep.subr.mxu0 %v1209_v0 }
  0x2b   :  { %1004 = vmatpush3.msra.mxu0 %v1259_v3 }
  0x2c   :  { %1005 = vmatprep.subr.mxu0 %v1209_v0 }
  0x2d   :  { %1006 = vmatpush3.msra.mxu0 %v1265_v4 }
  0x2e   :  { %1021 = vmatprep.subr.mxu0 %v1209_v0 }
  0xe6   :  { %v124_v7 = vpop.f32.mrf.mxu0 }
  0xe7   :  { %v128_v8 = vadd.f32 %v124_v7, %v53_v6 }
  0xe8   :  { %v987_v9 = vpop.f32.mrf.mxu0 }
  0xe9   :  { %1075 = vtanh.f32 %v128_v8  ;;  %v922_v12 = vmul.f32 -1.442695, %v128_v8 }
  0xeb   :  { %1077 = vpow2.f32 %v922_v12 }
  0xf6   :  { %v1076_v10 = vpop.eup %1075 }
  0xf7   :  { %142 = vrot.lane.b32.xlu0 %v1076_v10, %s1211_s0 }
  0xf8   :  { %v1078_v13 = vpop.eup %1077 }
  0xf9   :  { %v132_v14 = vadd.f32 1.0, %v1078_v13 }
  0xfb   :  { %137 = vrot.lane.b32.xlu0 %v52_v11, %s1212_s1  ;;  %1079 = vrcp.f32 %v132_v14 }
 0x108   :  { %v1080_v15 = vpop.eup %1079 }
 0x169   :  { %v143_v16 = vpop.permute.xlu0 %142 }
 0x16a   :  { %v145_v17 = vmul.f32 %v1080_v15, %v143_v16 }
 0x16c   :  { %147 = vrot.lane.b32.xlu1 %v145_v17, %s1212_s1 }
 0x16d   :  { %v138_v18 = vpop.permute.xlu0 %137 }
 0x16e   :  { %v140_v19 = vmul.f32 %v1080_v15, %v138_v18 }
 0x1de   :  { %v148_v20 = vpop.permute.xlu1 %147 }
 0x1df   :  { %v150_v21 = vadd.f32 %v148_v20, %v140_v19 }
 0x1e1   :  { %1081 = vtanh.f32 %v150_v21 }
 0x1ee   :  { %v1082_v22 = vpop.eup %1081 }
 0x1ef   :  { %153 = vrot.lane.b32.xlu1 %v1082_v22, %s1211_s0 }
 0x261   :  { %v154_v23 = vpop.permute.xlu1 %153 }
 0x262   :  { %v156_v24 = vmul.f32 %v1080_v15, %v154_v23 }
 0x264   :  { %158 = vrot.lane.b32.xlu0 %v156_v24, %s1212_s1 }
 0x2d6   :  { %v159_v25 = vpop.permute.xlu0 %158 }
 0x2d7   :  { %161 = vst.msk [vmem:[#allocation9] sm:$0xff] %vm44_vm0, %v159_v25  ;;  %997 = vmatmul.mubr.msk.f32.vlgmr.msra.gmra.mxu1 %vm44_vm0, %v159_v25 }
 0x2d8   :  { %1011 = vmatpush3.msra.mxu1 %v1252_v1  ;;  %1018 = vmatprep.mubr.msk.f32.mxu1 %vm1210_vm1, %v1209_v0 }
 0x2d9   :  { %1012 = vmatprep.subr.mxu1 %v1209_v0 }
 0x2da   :  { %1013 = vmatpush3.msra.mxu1 %v1254_v2 }
 0x2db   :  { %1014 = vmatprep.subr.mxu1 %v1209_v0 }
 0x2dc   :  { %1015 = vmatpush3.msra.mxu1 %v1259_v3 }
 0x2dd   :  { %1016 = vmatprep.subr.mxu1 %v1209_v0 }
 0x2de   :  { %1017 = vmatpush3.msra.mxu1 %v1265_v4 }
 0x2df   :  { %1032 = vmatprep.subr.mxu1 %v1209_v0 }
 0x397   :  { %v232_v27 = vpop.f32.mrf.mxu1 }
 0x398   :  { %v236_v28 = vadd.f32 %v232_v27, %v163_v26 }
 0x399   :  { %v998_v29 = vpop.f32.mrf.mxu1 }
 0x39a   :  { %1083 = vtanh.f32 %v236_v28  ;;  %v924_v31 = vmul.f32 -1.442695, %v236_v28 }
 0x39c   :  { %1085 = vpow2.f32 %v924_v31 }
 0x3a7   :  { %v1084_v30 = vpop.eup %1083 }
 0x3a8   :  { %246 = vrot.lane.b32.xlu1 %v1084_v30, %s1211_s0 }
 0x3a9   :  { %v1086_v32 = vpop.eup %1085 }
 0x3aa   :  { %v240_v33 = vadd.f32 1.0, %v1086_v32 }
 0x3ac   :  { %1087 = vrcp.f32 %v240_v33 }
 0x3b9   :  { %v1088_v34 = vpop.eup %1087 }
 0x3ba   :  { %v244_v37 = vmul.f32 %v1088_v34, %v150_v21  ;;  %v478_v21 = vld [vmem:[#allocation4 + $0x20] sm:$0xff] }
 0x41a   :  { %v247_v35 = vpop.permute.xlu1 %246 }
 0x41b   :  { %v249_v36 = vmul.f32 %v1088_v34, %v247_v35 }
 0x41d   :  { %251 = vrot.lane.b32.xlu0 %v249_v36, %s1212_s1 }
 0x48f   :  { %v252_v38 = vpop.permute.xlu0 %251 }
 0x490   :  { %v254_v39 = vadd.f32 %v252_v38, %v244_v37 }
 0x492   :  { %1089 = vtanh.f32 %v254_v39 }
 0x49f   :  { %v1090_v40 = vpop.eup %1089 }
 0x4a0   :  { %257 = vrot.lane.b32.xlu1 %v1090_v40, %s1211_s0 }
 0x512   :  { %v258_v41 = vpop.permute.xlu1 %257 }
 0x513   :  { %v260_v42 = vmul.f32 %v1088_v34, %v258_v41 }
 0x515   :  { %262 = vrot.lane.b32.xlu0 %v260_v42, %s1212_s1 }
 0x587   :  { %v263_v43 = vpop.permute.xlu0 %262 }
 0x588   :  { %266 = vst.msk [vmem:[#allocation9 + $0x8] sm:$0xff] %vm44_vm0, %v263_v43  ;;  %1008 = vmatmul.mubr.msk.f32.vlgmr.msra.gmra.mxu0 %vm44_vm0, %v263_v43 }
 0x589   :  { %1022 = vmatpush3.msra.mxu0 %v1252_v1  ;;  %1029 = vmatprep.mubr.msk.f32.mxu0 %vm1210_vm1, %v1209_v0 }
 0x58a   :  { %1023 = vmatprep.subr.mxu0 %v1209_v0 }
 0x58b   :  { %1024 = vmatpush3.msra.mxu0 %v1254_v2 }
 0x58c   :  { %1025 = vmatprep.subr.mxu0 %v1209_v0 }
 0x58d   :  { %1026 = vmatpush3.msra.mxu0 %v1259_v3 }
 0x58e   :  { %1027 = vmatprep.subr.mxu0 %v1209_v0 }
 0x58f   :  { %1028 = vmatpush3.msra.mxu0 %v1265_v4 }
 0x590   :  { %1043 = vmatprep.subr.mxu0 %v1209_v0 }
 0x648   :  { %v337_v45 = vpop.f32.mrf.mxu0 }
 0x649   :  { %v341_v46 = vadd.f32 %v337_v45, %v268_v44 }
 0x64a   :  { %v1009_v47 = vpop.f32.mrf.mxu0 }
 0x64b   :  { %1091 = vtanh.f32 %v341_v46  ;;  %v926_v49 = vmul.f32 -1.442695, %v341_v46 }
 0x64d   :  { %1093 = vpow2.f32 %v926_v49 }
 0x658   :  { %v1092_v48 = vpop.eup %1091 }
 0x659   :  { %351 = vrot.lane.b32.xlu1 %v1092_v48, %s1211_s0 }
 0x65a   :  { %v1094_v50 = vpop.eup %1093 }
 0x65b   :  { %v345_v51 = vadd.f32 1.0, %v1094_v50 }
 0x65d   :  { %1095 = vrcp.f32 %v345_v51 }
 0x66a   :  { %v1096_v52 = vpop.eup %1095 }
 0x66b   :  { %v349_v55 = vmul.f32 %v1096_v52, %v254_v39  ;;  %v583_v39 = vld [vmem:[#allocation4 + $0x28] sm:$0xff] }
 0x6cb   :  { %v352_v53 = vpop.permute.xlu1 %351 }
 0x6cc   :  { %v354_v54 = vmul.f32 %v1096_v52, %v352_v53 }
 0x6ce   :  { %356 = vrot.lane.b32.xlu0 %v354_v54, %s1212_s1 }
 0x740   :  { %v357_v56 = vpop.permute.xlu0 %356 }
 0x741   :  { %v359_v57 = vadd.f32 %v357_v56, %v349_v55 }
 0x743   :  { %1097 = vtanh.f32 %v359_v57 }
 0x750   :  { %v1098_v58 = vpop.eup %1097 }
 0x751   :  { %362 = vrot.lane.b32.xlu1 %v1098_v58, %s1211_s0 }
 0x7c3   :  { %v363_v59 = vpop.permute.xlu1 %362 }
 0x7c4   :  { %v365_v60 = vmul.f32 %v1096_v52, %v363_v59  ;;  %v688_v52 = vld [vmem:[#allocation4 + $0x30] sm:$0xff] }
 0x7c6   :  { %367 = vrot.lane.b32.xlu0 %v365_v60, %s1212_s1 }
 0x838   :  { %v368_v61 = vpop.permute.xlu0 %367 }
 0x839   :  { %371 = vst.msk [vmem:[#allocation9 + $0x10] sm:$0xff] %vm44_vm0, %v368_v61  ;;  %1019 = vmatmul.mubr.msk.f32.vlgmr.msra.gmra.mxu1 %vm44_vm0, %v368_v61 }
 0x83a   :  { %1033 = vmatpush3.msra.mxu1 %v1252_v1  ;;  %1040 = vmatprep.mubr.msk.f32.mxu1 %vm1210_vm1, %v1209_v0 }
 0x83b   :  { %1034 = vmatprep.subr.mxu1 %v1209_v0 }
 0x83c   :  { %1035 = vmatpush3.msra.mxu1 %v1254_v2 }
 0x83d   :  { %1036 = vmatprep.subr.mxu1 %v1209_v0 }
 0x83e   :  { %1037 = vmatpush3.msra.mxu1 %v1259_v3 }
 0x83f   :  { %1038 = vmatprep.subr.mxu1 %v1209_v0 }
 0x840   :  { %1039 = vmatpush3.msra.mxu1 %v1265_v4 }
 0x841   :  { %1054 = vmatprep.subr.mxu1 %v1209_v0 }
 0x8f9   :  { %v442_v63 = vpop.f32.mrf.mxu1 }
 0x8fa   :  { %v446_v5 = vadd.f32 %v442_v63, %v373_v62 }
 0x8fb   :  { %v1020_v6 = vpop.f32.mrf.mxu1 }
 0x8fc   :  { %1099 = vtanh.f32 %v446_v5  ;;  %v928_v8 = vmul.f32 -1.442695, %v446_v5 }
 0x8fe   :  { %1101 = vpow2.f32 %v928_v8 }
 0x909   :  { %v1100_v7 = vpop.eup %1099 }
 0x90a   :  { %456 = vrot.lane.b32.xlu1 %v1100_v7, %s1211_s0 }
 0x90b   :  { %v1102_v9 = vpop.eup %1101 }
 0x90c   :  { %v450_v10 = vadd.f32 1.0, %v1102_v9 }
 0x90e   :  { %1103 = vrcp.f32 %v450_v10 }
 0x91b   :  { %v1104_v11 = vpop.eup %1103 }
 0x91c   :  { %v454_v14 = vmul.f32 %v1104_v11, %v359_v57 }
 0x97c   :  { %v457_v12 = vpop.permute.xlu1 %456 }
 0x97d   :  { %v459_v13 = vmul.f32 %v1104_v11, %v457_v12 }
 0x97f   :  { %461 = vrot.lane.b32.xlu0 %v459_v13, %s1212_s1 }
 0x9f1   :  { %v462_v15 = vpop.permute.xlu0 %461 }
 0x9f2   :  { %v464_v16 = vadd.f32 %v462_v15, %v454_v14 }
 0x9f4   :  { %1105 = vtanh.f32 %v464_v16 }
 0xa01   :  { %v1106_v17 = vpop.eup %1105 }
 0xa02   :  { %467 = vrot.lane.b32.xlu1 %v1106_v17, %s1211_s0 }
 0xa74   :  { %v468_v18 = vpop.permute.xlu1 %467 }
 0xa75   :  { %v470_v19 = vmul.f32 %v1104_v11, %v468_v18  ;;  %v793_v11 = vld [vmem:[#allocation4 + $0x38] sm:$0xff] }
 0xa77   :  { %472 = vrot.lane.b32.xlu0 %v470_v19, %s1212_s1 }
 0xae9   :  { %v473_v20 = vpop.permute.xlu0 %472 }
 0xaea   :  { %476 = vst.msk [vmem:[#allocation9 + $0x18] sm:$0xff] %vm44_vm0, %v473_v20  ;;  %1030 = vmatmul.mubr.msk.f32.vlgmr.msra.gmra.mxu0 %vm44_vm0, %v473_v20 }
 0xaeb   :  { %1044 = vmatpush3.msra.mxu0 %v1252_v1  ;;  %1051 = vmatprep.mubr.msk.f32.mxu0 %vm1210_vm1, %v1209_v0 }
 0xaec   :  { %1045 = vmatprep.subr.mxu0 %v1209_v0 }
 0xaed   :  { %1046 = vmatpush3.msra.mxu0 %v1254_v2 }
 0xaee   :  { %1047 = vmatprep.subr.mxu0 %v1209_v0 }
 0xaef   :  { %1048 = vmatpush3.msra.mxu0 %v1259_v3 }
 0xaf0   :  { %1049 = vmatprep.subr.mxu0 %v1209_v0 }
 0xaf1   :  { %1050 = vmatpush3.msra.mxu0 %v1265_v4 }
 0xbaa   :  { %v547_v22 = vpop.f32.mrf.mxu0 }
 0xbab   :  { %v551_v23 = vadd.f32 %v547_v22, %v478_v21 }
 0xbac   :  { %v1031_v24 = vpop.f32.mrf.mxu0 }
 0xbad   :  { %1107 = vtanh.f32 %v551_v23  ;;  %v930_v26 = vmul.f32 -1.442695, %v551_v23 }
 0xbaf   :  { %1109 = vpow2.f32 %v930_v26 }
 0xbba   :  { %v1108_v25 = vpop.eup %1107 }
 0xbbb   :  { %561 = vrot.lane.b32.xlu1 %v1108_v25, %s1211_s0 }
 0xbbc   :  { %v1110_v27 = vpop.eup %1109 }
 0xbbd   :  { %v555_v28 = vadd.f32 1.0, %v1110_v27 }
 0xbbf   :  { %1111 = vrcp.f32 %v555_v28 }
 0xbcc   :  { %v1112_v29 = vpop.eup %1111 }
 0xbcd   :  { %v559_v32 = vmul.f32 %v1112_v29, %v464_v16 }
 0xc2d   :  { %v562_v30 = vpop.permute.xlu1 %561 }
 0xc2e   :  { %v564_v31 = vmul.f32 %v1112_v29, %v562_v30 }
 0xc30   :  { %566 = vrot.lane.b32.xlu0 %v564_v31, %s1212_s1 }
 0xca2   :  { %v567_v33 = vpop.permute.xlu0 %566 }
 0xca3   :  { %v569_v34 = vadd.f32 %v567_v33, %v559_v32 }
 0xca5   :  { %1113 = vtanh.f32 %v569_v34 }
 0xcb2   :  { %v1114_v35 = vpop.eup %1113 }
 0xcb3   :  { %572 = vrot.lane.b32.xlu1 %v1114_v35, %s1211_s0 }
 0xd25   :  { %v573_v36 = vpop.permute.xlu1 %572 }
 0xd26   :  { %v575_v37 = vmul.f32 %v1112_v29, %v573_v36 }
 0xd28   :  { %577 = vrot.lane.b32.xlu0 %v575_v37, %s1212_s1 }
 0xd9a   :  { %v578_v38 = vpop.permute.xlu0 %577 }
 0xd9b   :  { %581 = vst.msk [vmem:[#allocation9 + $0x20] sm:$0xff] %vm44_vm0, %v578_v38  ;;  %1041 = vmatmul.mubr.msk.f32.vlgmr.msra.gmra.mxu1 %vm44_vm0, %v578_v38 }
 0xd9c   :  { %1055 = vmatpush3.msra.mxu1 %v1252_v1  ;;  %1062 = vmatprep.mubr.msk.f32.mxu1 %vm1210_vm1, %v1209_v0 }
 0xd9d   :  { %1056 = vmatprep.subr.mxu1 %v1209_v0 }
 0xd9e   :  { %1057 = vmatpush3.msra.mxu1 %v1254_v2 }
 0xd9f   :  { %1058 = vmatprep.subr.mxu1 %v1209_v0 }
 0xda0   :  { %1059 = vmatpush3.msra.mxu1 %v1259_v3 }
 0xda1   :  { %1060 = vmatprep.subr.mxu1 %v1209_v0 }
 0xda2   :  { %1061 = vmatpush3.msra.mxu1 %v1265_v4 }
 0xe5b   :  { %v652_v40 = vpop.f32.mrf.mxu1 }
 0xe5c   :  { %v656_v41 = vadd.f32 %v652_v40, %v583_v39 }
 0xe5d   :  { %v1042_v42 = vpop.f32.mrf.mxu1 }
 0xe5e   :  { %1115 = vtanh.f32 %v656_v41  ;;  %v932_v43 = vmul.f32 -1.442695, %v656_v41 }
 0xe60   :  { %1117 = vpow2.f32 %v932_v43 }
 0xe6b   :  { %v1116_v1 = vpop.eup %1115 }
 0xe6c   :  { %666 = vrot.lane.b32.xlu1 %v1116_v1, %s1211_s0 }
 0xe6d   :  { %v1118_v44 = vpop.eup %1117 }
 0xe6e   :  { %v660_v2 = vadd.f32 1.0, %v1118_v44 }
 0xe70   :  { %1119 = vrcp.f32 %v660_v2 }
 0xe7d   :  { %v1120_v45 = vpop.eup %1119 }
 0xe7e   :  { %v664_v0 = vmul.f32 %v1120_v45, %v569_v34 }
 0xede   :  { %v667_v46 = vpop.permute.xlu1 %666 }
 0xedf   :  { %v669_v3 = vmul.f32 %v1120_v45, %v667_v46 }
 0xee1   :  { %671 = vrot.lane.b32.xlu0 %v669_v3, %s1212_s1 }
 0xf53   :  { %v672_v4 = vpop.permute.xlu0 %671 }
 0xf54   :  { %v674_v47 = vadd.f32 %v672_v4, %v664_v0 }
 0xf56   :  { %1121 = vtanh.f32 %v674_v47 }
 0xf63   :  { %v1122_v48 = vpop.eup %1121 }
 0xf64   :  { %677 = vrot.lane.b32.xlu1 %v1122_v48, %s1211_s0 }
 0xfd6   :  { %v678_v49 = vpop.permute.xlu1 %677 }
 0xfd7   :  { %v680_v50 = vmul.f32 %v1120_v45, %v678_v49 }
 0xfd9   :  { %682 = vrot.lane.b32.xlu0 %v680_v50, %s1212_s1 }
0x104b   :  { %v683_v51 = vpop.permute.xlu0 %682 }
0x104c   :  { %686 = vst.msk [vmem:[#allocation9 + $0x28] sm:$0xff] %vm44_vm0, %v683_v51  ;;  %1052 = vmatmul.mubr.msk.f32.vlgmr.msra.gmra.mxu0 %vm44_vm0, %v683_v51 }
0x110c   :  { %v757_v53 = vpop.f32.mrf.mxu0 }
0x110d   :  { %v761_v54 = vadd.f32 %v757_v53, %v688_v52 }
0x110e   :  { %v1053_v55 = vpop.f32.mrf.mxu0 }
0x110f   :  { %1123 = vtanh.f32 %v761_v54  ;;  %v934_v57 = vmul.f32 -1.442695, %v761_v54 }
0x1111   :  { %1125 = vpow2.f32 %v934_v57 }
0x111c   :  { %v1124_v56 = vpop.eup %1123 }
0x111d   :  { %771 = vrot.lane.b32.xlu1 %v1124_v56, %s1211_s0 }
0x111e   :  { %v1126_v58 = vpop.eup %1125 }
0x111f   :  { %v765_v59 = vadd.f32 1.0, %v1126_v58 }
0x1121   :  { %1127 = vrcp.f32 %v765_v59 }
0x112e   :  { %v1128_v60 = vpop.eup %1127 }
0x112f   :  { %v769_v63 = vmul.f32 %v1128_v60, %v674_v47 }
0x118f   :  { %v772_v61 = vpop.permute.xlu1 %771 }
0x1190   :  { %v774_v62 = vmul.f32 %v1128_v60, %v772_v61 }
0x1192   :  { %776 = vrot.lane.b32.xlu0 %v774_v62, %s1212_s1 }
0x1204   :  { %v777_v5 = vpop.permute.xlu0 %776 }
0x1205   :  { %v779_v6 = vadd.f32 %v777_v5, %v769_v63 }
0x1207   :  { %1129 = vtanh.f32 %v779_v6 }
0x1214   :  { %v1130_v7 = vpop.eup %1129 }
0x1215   :  { %782 = vrot.lane.b32.xlu1 %v1130_v7, %s1211_s0 }
0x1287   :  { %v783_v8 = vpop.permute.xlu1 %782 }
0x1288   :  { %v785_v9 = vmul.f32 %v1128_v60, %v783_v8 }
0x128a   :  { %787 = vrot.lane.b32.xlu0 %v785_v9, %s1212_s1 }
0x12fc   :  { %v788_v10 = vpop.permute.xlu0 %787 }
0x12fd   :  { %791 = vst.msk [vmem:[#allocation9 + $0x30] sm:$0xff] %vm44_vm0, %v788_v10  ;;  %1063 = vmatmul.mubr.msk.f32.vlgmr.msra.gmra.mxu1 %vm44_vm0, %v788_v10 }
0x13bd   :  { %v862_v12 = vpop.f32.mrf.mxu1 }
0x13be   :  { %v866_v13 = vadd.f32 %v862_v12, %v793_v11 }
0x13bf   :  { %v1064_v14 = vpop.f32.mrf.mxu1 }
0x13c0   :  { %1131 = vtanh.f32 %v866_v13  ;;  %v936_v16 = vmul.f32 -1.442695, %v866_v13 }
0x13c2   :  { %1133 = vpow2.f32 %v936_v16 }
0x13cd   :  { %v1132_v15 = vpop.eup %1131 }
0x13ce   :  { %876 = vrot.lane.b32.xlu1 %v1132_v15, %s1211_s0 }
0x13cf   :  { %v1134_v17 = vpop.eup %1133 }
0x13d0   :  { %v870_v18 = vadd.f32 1.0, %v1134_v17 }
0x13d2   :  { %1135 = vrcp.f32 %v870_v18 }
0x13df   :  { %v1136_v19 = vpop.eup %1135 }
0x13e0   :  { %v874_v22 = vmul.f32 %v1136_v19, %v779_v6 }
0x1440   :  { %v877_v20 = vpop.permute.xlu1 %876 }
0x1441   :  { %v879_v21 = vmul.f32 %v1136_v19, %v877_v20 }
0x1443   :  { %881 = vrot.lane.b32.xlu0 %v879_v21, %s1212_s1 }
0x14b5   :  { %v882_v23 = vpop.permute.xlu0 %881 }
0x14b6   :  { %v884_v24 = vadd.f32 %v882_v23, %v874_v22 }
0x14b8   :  { %1137 = vtanh.f32 %v884_v24 }
0x14c5   :  { %v1138_v25 = vpop.eup %1137 }
0x14c6   :  { %887 = vrot.lane.b32.xlu1 %v1138_v25, %s1211_s0 }
0x14ca   :  { %899 = vrot.lane.b32.xlu1 %v884_v24, %s1213_s21 }
0x1538   :  { %v888_v26 = vpop.permute.xlu1 %887 }
0x1539   :  { %v890_v27 = vmul.f32 %v1136_v19, %v888_v26 }
0x153b   :  { %892 = vrot.lane.b32.xlu0 %v890_v27, %s1212_s1 }
0x153c   :  { %v900_v28 = vpop.permute.xlu1 %899 }
0x153d   :  { %902 = vst.msk [vmem:[#allocation3] sm:$0xff] %vm44_vm0, %v900_v28 }
0x15ad   :  { %v893_v29 = vpop.permute.xlu0 %892 }
0x15ae   :  { %896 = vst.msk [vmem:[#allocation9 + $0x38] sm:$0xff] %vm44_vm0, %v893_v29  ;;  %897 = vst.msk [vmem:[#allocation2] sm:$0xff] %vm44_vm0, %v893_v29 }
0x15af   :  { %1190 = shalt.err (!%p1187_p0)
}
0x15b0   :  { %914 = dma.vmem_to_hbm [thread:$0]  %s909_s23, 1024, %s1393_s2, [#allocation6], %s1206_s12, %s1206_s12, %s1207_s13  }
0x15b1   :  { %1203 = dma.done.wait [#allocation6], 1024  }
0x15b2   :  { %1204 = vsyncadd [#allocation6], 4294966272 }
0x15b3   :  { %918 = vsyncpa [#allocation5], 1 }
0x15b4   :  { %919 = vsyncpa [#allocation8], 1 }
0x15b5   :  { %920 = vsyncpa [#allocation6], 1 }

// kernel: tpu_custom_call.1
= control target key start
LH: loop header
LB: loop body
LE: loop exit
PB: predicated region body
PF: predicated region fallthrough
CT: control target
= control target key end

     0   :  { %7 = vsyncpa [#allocation5], 0  ;;  %s1391_s0 = inlined_call_operand.hbm [shape: f32[8,8,128], index: 0, kind: input, shape index: {}]   ;;  %s1392_s1 = inlined_call_operand.hbm [shape: f32[32,128], index: 1, kind: input, shape index: {}]   ;;  %s1393_s2 = inlined_call_operand.hbm [shape: f32[8,8,32], index: 2, kind: output, shape index: {}]  }
   0x1   :  { %8 = vsyncpa [#allocation8], 0 }
   0x2   :  { %9 = vsyncpa [#allocation6], 0  ;;  %s1205_s9 = smov [#allocation4]  }
   0x3   :  { %s15_s10 = sshll.u32 %s1205_s9, 4  ;;  %s16_s10 = int_to_ptr.vmem [resolvable:$true] %s15_s10 }
   0x4   :  { %s1147_s11 = scalar_lea.vmem %s16_s10, 1024  ;;  %p1152_p1 = scmp.lt.s32.totalorder %s16_s10, %s16_s10 }
   0x5   :  { %p1148_p0 = scmp.ne.s32.totalorder %s16_s10, %s1147_s11  ;;  %p1153_p2 = scmp.lt.s32.totalorder %s1147_s11, %s1147_s11 }
   0x7   :  { %p1154_p3 = por %p1153_p2, %p1152_p1 }
   0x9   :  { %p1155_p4 = pnand %p1154_p3, %p1148_p0 }
   0xb   :  { %1158 = shalt.err (!%p1155_p4)
}
   0xc   :  { %s1206_s12 = smov 128   ;;  %s1207_s13 = smov 8  }
   0xd   :  { %21 = dma.hbm_to_vmem [thread:$0]  %s1391_s0, 1024, %s16_s10, [#allocation5], %s1206_s12, %s1206_s12, %s1207_s13  }
   0xe   :  { %s1208_s16 = smov [#allocation7]  }
   0xf   :  { %s27_s17 = sshll.u32 %s1208_s16, 4  ;;  %s28_s17 = int_to_ptr.vmem [resolvable:$true] %s27_s17 }
  0x10   :  { %s1167_s18 = scalar_lea.vmem %s28_s17, 512  ;;  %p1172_p6 = scmp.lt.s32.totalorder %s28_s17, %s28_s17 }
  0x11   :  { %p1168_p5 = scmp.ne.s32.totalorder %s28_s17, %s1167_s18  ;;  %p1173_p7 = scmp.lt.s32.totalorder %s1167_s18, %s1167_s18 }
  0x13   :  { %p1174_p8 = por %p1173_p7, %p1172_p6 }
  0x15   :  { %p1175_p9 = pnand %p1174_p8, %p1168_p5 }
  0x17   :  { %1178 = shalt.err (!%p1175_p9)
}
  0x18   :  { %33 = dma.hbm_to_vmem [thread:$0]  %s1392_s1, 512, %s28_s17, [#allocation8], %s1206_s12, %s1206_s12, %s1207_s13  }
  0x19   :  { %1199 = dma.done.wait [#allocation5], 1024  }
  0x1a   :  { %1200 = vsyncadd [#allocation5], 4294966272 }
  0x1b   :  { %1201 = dma.done.wait [#allocation8], 512  }
  0x1c   :  { %1202 = vsyncadd [#allocation8], 4294966784  ;;  %vm44_vm0 = vcmask 261120   ;;  %v1209_v0 = vmov 0.0   ;;  %vm1210_vm1 = vmmov 0   ;;  %v1252_v1 = vld [vmem:[#allocation7 + $0x18] sm:$0xff] }
  0x1d   :  { %977 = vmatprep.subr.mxu0 %v1209_v0  ;;  %985 = vmatprep.mubr.msk.f32.mxu0 %vm1210_vm1, %v1209_v0  ;;  %45 = vst.msk [vmem:[#allocation2] sm:$0xff] %vm44_vm0, %v1209_v0  ;;  %46 = vst.msk [vmem:[#allocation3] sm:$0xff] %vm44_vm0, %v1209_v0  ;;  %v1254_v2 = vld [vmem:[#allocation7 + $0x10] sm:$0xff]  ;;  %v1259_v3 = vld [vmem:[#allocation7 + $0x8] sm:$0xff]  ;;  %s1211_s0 = smov 64   ;;  %s1212_s1 = smov 32  }
  0x1e   :  { %988 = vmatprep.subr.mxu1 %v1209_v0  ;;  %996 = vmatprep.mubr.msk.f32.mxu1 %vm1210_vm1, %v1209_v0  ;;  %v1265_v4 = vld [vmem:[#allocation7] sm:$0xff]  ;;  %v163_v26 = vld [vmem:[#allocation4 + $0x8] sm:$0xff]  ;;  %v268_v44 = vld [vmem:[#allocation4 + $0x10] sm:$0xff]  ;;  %s1213_s21 = smov 96   ;;  %s1214_s22 = smov [#allocation9]  }
  0x1f   :  { %978 = vmatpush3.msra.mxu0 %v1252_v1  ;;  %989 = vmatpush3.msra.mxu1 %v1252_v1  ;;  %v53_v6 = vld [vmem:[#allocation4] sm:$0xff]  ;;  %v373_v62 = vld [vmem:[#allocation4 + $0x18] sm:$0xff]  ;;  %s908_s23 = sshll.u32 %s1214_s22, 4  ;;  %s909_s23 = int_to_ptr.vmem [resolvable:$true] %s908_s23 }
  0x20   :  { %979 = vmatprep.subr.mxu0 %v1209_v0  ;;  %990 = vmatprep.subr.mxu1 %v1209_v0  ;;  %s1179_s24 = scalar_lea.vmem %s909_s23, 1024  ;;  %p1184_p11 = scmp.lt.s32.totalorder %s909_s23, %s909_s23 }
  0x21   :  { %980 = vmatpush3.msra.mxu0 %v1254_v2  ;;  %991 = vmatpush3.msra.mxu1 %v1254_v2  ;;  %p1180_p10 = scmp.ne.s32.totalorder %s909_s23, %s1179_s24  ;;  %p1185_p12 = scmp.lt.s32.totalorder %s1179_s24, %s1179_s24 }
  0x22   :  { %981 = vmatprep.subr.mxu0 %v1209_v0  ;;  %992 = vmatprep.subr.mxu1 %v1209_v0 }
  0x23   :  { %982 = vmatpush3.msra.mxu0 %v1259_v3  ;;  %993 = vmatpush3.msra.mxu1 %v1259_v3  ;;  %p1186_p13 = por %p1185_p12, %p1184_p11 }
  0x24   :  { %v51_v5 = vld [vmem:[#allocation2] sm:$0xff]  ;;  %983 = vmatprep.subr.mxu0 %v1209_v0  ;;  %994 = vmatprep.subr.mxu1 %v1209_v0  ;;  %v52_v11 = vld [vmem:[#allocation3] sm:$0xff] }
  0x25   :  { %984 = vmatpush3.msra.mxu0 %v1265_v4  ;;  %995 = vmatpush3.msra.mxu1 %v1265_v4  ;;  %p1187_p0 = pnand %p1186_p13, %p1180_p10 }
  0x26   :  { %986 = vmatmul.mubr.msk.f32.vlgmr.msra.gmra.mxu0 %vm44_vm0, %v51_v5  ;;  %999 = vmatprep.subr.mxu0 %v1209_v0 }
  0x27   :  { %1000 = vmatpush3.msra.mxu0 %v1252_v1  ;;  %1007 = vmatprep.mubr.msk.f32.mxu0 %vm1210_vm1, %v1209_v0 }
  0x28   :  { %1001 = vmatprep.subr.mxu0 %v1209_v0  ;;  %1010 = vmatprep.subr.mxu1 %v1209_v0 }
  0x29   :  { %1002 = vmatpush3.msra.mxu0 %v1254_v2 }
  0x2a   :  { %1003 = vmatprep.subr.mxu0 %v1209_v0 }
  0x2b   :  { %1004 = vmatpush3.msra.mxu0 %v1259_v3 }
  0x2c   :  { %1005 = vmatprep.subr.mxu0 %v1209_v0 }
  0x2d   :  { %1006 = vmatpush3.msra.mxu0 %v1265_v4 }
  0x2e   :  { %1021 = vmatprep.subr.mxu0 %v1209_v0 }
  0xe6   :  { %v124_v7 = vpop.f32.mrf.mxu0 }
  0xe7   :  { %v128_v8 = vadd.f32 %v124_v7, %v53_v6 }
  0xe8   :  { %v987_v9 = vpop.f32.mrf.mxu0 }
  0xe9   :  { %1075 = vtanh.f32 %v128_v8  ;;  %v922_v12 = vmul.f32 -1.442695, %v128_v8 }
  0xeb   :  { %1077 = vpow2.f32 %v922_v12 }
  0xf6   :  { %v1076_v10 = vpop.eup %1075 }
  0xf7   :  { %142 = vrot.lane.b32.xlu0 %v1076_v10, %s1211_s0 }
  0xf8   :  { %v1078_v13 = vpop.eup %1077 }
  0xf9   :  { %v132_v14 = vadd.f32 1.0, %v1078_v13 }
  0xfb   :  { %137 = vrot.lane.b32.xlu0 %v52_v11, %s1212_s1  ;;  %1079 = vrcp.f32 %v132_v14 }
 0x108   :  { %v1080_v15 = vpop.eup %1079 }
 0x169   :  { %v143_v16 = vpop.permute.xlu0 %142 }
 0x16a   :  { %v145_v17 = vmul.f32 %v1080_v15, %v143_v16 }
 0x16c   :  { %147 = vrot.lane.b32.xlu1 %v145_v17, %s1212_s1 }
 0x16d   :  { %v138_v18 = vpop.permute.xlu0 %137 }
 0x16e   :  { %v140_v19 = vmul.f32 %v1080_v15, %v138_v18 }
 0x1de   :  { %v148_v20 = vpop.permute.xlu1 %147 }
 0x1df   :  { %v150_v21 = vadd.f32 %v148_v20, %v140_v19 }
 0x1e1   :  { %1081 = vtanh.f32 %v150_v21 }
 0x1ee   :  { %v1082_v22 = vpop.eup %1081 }
 0x1ef   :  { %153 = vrot.lane.b32.xlu1 %v1082_v22, %s1211_s0 }
 0x261   :  { %v154_v23 = vpop.permute.xlu1 %153 }
 0x262   :  { %v156_v24 = vmul.f32 %v1080_v15, %v154_v23 }
 0x264   :  { %158 = vrot.lane.b32.xlu0 %v156_v24, %s1212_s1 }
 0x2d6   :  { %v159_v25 = vpop.permute.xlu0 %158 }
 0x2d7   :  { %161 = vst.msk [vmem:[#allocation9] sm:$0xff] %vm44_vm0, %v159_v25  ;;  %997 = vmatmul.mubr.msk.f32.vlgmr.msra.gmra.mxu1 %vm44_vm0, %v159_v25 }
 0x2d8   :  { %1011 = vmatpush3.msra.mxu1 %v1252_v1  ;;  %1018 = vmatprep.mubr.msk.f32.mxu1 %vm1210_vm1, %v1209_v0 }
 0x2d9   :  { %1012 = vmatprep.subr.mxu1 %v1209_v0 }
 0x2da   :  { %1013 = vmatpush3.msra.mxu1 %v1254_v2 }
 0x2db   :  { %1014 = vmatprep.subr.mxu1 %v1209_v0 }
 0x2dc   :  { %1015 = vmatpush3.msra.mxu1 %v1259_v3 }
 0x2dd   :  { %1016 = vmatprep.subr.mxu1 %v1209_v0 }
 0x2de   :  { %1017 = vmatpush3.msra.mxu1 %v1265_v4 }
 0x2df   :  { %1032 = vmatprep.subr.mxu1 %v1209_v0 }
 0x397   :  { %v232_v27 = vpop.f32.mrf.mxu1 }
 0x398   :  { %v236_v28 = vadd.f32 %v232_v27, %v163_v26 }
 0x399   :  { %v998_v29 = vpop.f32.mrf.mxu1 }
 0x39a   :  { %1083 = vtanh.f32 %v236_v28  ;;  %v924_v31 = vmul.f32 -1.442695, %v236_v28 }
 0x39c   :  { %1085 = vpow2.f32 %v924_v31 }
 0x3a7   :  { %v1084_v30 = vpop.eup %1083 }
 0x3a8   :  { %246 = vrot.lane.b32.xlu1 %v1084_v30, %s1211_s0 }
 0x3a9   :  { %v1086_v32 = vpop.eup %1085 }
 0x3aa   :  { %v240_v33 = vadd.f32 1.0, %v1086_v32 }
 0x3ac   :  { %1087 = vrcp.f32 %v240_v33 }
 0x3b9   :  { %v1088_v34 = vpop.eup %1087 }
 0x3ba   :  { %v244_v37 = vmul.f32 %v1088_v34, %v150_v21  ;;  %v478_v21 = vld [vmem:[#allocation4 + $0x20] sm:$0xff] }
 0x41a   :  { %v247_v35 = vpop.permute.xlu1 %246 }
 0x41b   :  { %v249_v36 = vmul.f32 %v1088_v34, %v247_v35 }
 0x41d   :  { %251 = vrot.lane.b32.xlu0 %v249_v36, %s1212_s1 }
 0x48f   :  { %v252_v38 = vpop.permute.xlu0 %251 }
 0x490   :  { %v254_v39 = vadd.f32 %v252_v38, %v244_v37 }
 0x492   :  { %1089 = vtanh.f32 %v254_v39 }
 0x49f   :  { %v1090_v40 = vpop.eup %1089 }
 0x4a0   :  { %257 = vrot.lane.b32.xlu1 %v1090_v40, %s1211_s0 }
 0x512   :  { %v258_v41 = vpop.permute.xlu1 %257 }
 0x513   :  { %v260_v42 = vmul.f32 %v1088_v34, %v258_v41 }
 0x515   :  { %262 = vrot.lane.b32.xlu0 %v260_v42, %s1212_s1 }
 0x587   :  { %v263_v43 = vpop.permute.xlu0 %262 }
 0x588   :  { %266 = vst.msk [vmem:[#allocation9 + $0x8] sm:$0xff] %vm44_vm0, %v263_v43  ;;  %1008 = vmatmul.mubr.msk.f32.vlgmr.msra.gmra.mxu0 %vm44_vm0, %v263_v43 }
 0x589   :  { %1022 = vmatpush3.msra.mxu0 %v1252_v1  ;;  %1029 = vmatprep.mubr.msk.f32.mxu0 %vm1210_vm1, %v1209_v0 }
 0x58a   :  { %1023 = vmatprep.subr.mxu0 %v1209_v0 }
 0x58b   :  { %1024 = vmatpush3.msra.mxu0 %v1254_v2 }
 0x58c   :  { %1025 = vmatprep.subr.mxu0 %v1209_v0 }
 0x58d   :  { %1026 = vmatpush3.msra.mxu0 %v1259_v3 }
 0x58e   :  { %1027 = vmatprep.subr.mxu0 %v1209_v0 }
 0x58f   :  { %1028 = vmatpush3.msra.mxu0 %v1265_v4 }
 0x590   :  { %1043 = vmatprep.subr.mxu0 %v1209_v0 }
 0x648   :  { %v337_v45 = vpop.f32.mrf.mxu0 }
 0x649   :  { %v341_v46 = vadd.f32 %v337_v45, %v268_v44 }
 0x64a   :  { %v1009_v47 = vpop.f32.mrf.mxu0 }
 0x64b   :  { %1091 = vtanh.f32 %v341_v46  ;;  %v926_v49 = vmul.f32 -1.442695, %v341_v46 }
 0x64d   :  { %1093 = vpow2.f32 %v926_v49 }
 0x658   :  { %v1092_v48 = vpop.eup %1091 }
 0x659   :  { %351 = vrot.lane.b32.xlu1 %v1092_v48, %s1211_s0 }
 0x65a   :  { %v1094_v50 = vpop.eup %1093 }
 0x65b   :  { %v345_v51 = vadd.f32 1.0, %v1094_v50 }
 0x65d   :  { %1095 = vrcp.f32 %v345_v51 }
 0x66a   :  { %v1096_v52 = vpop.eup %1095 }
 0x66b   :  { %v349_v55 = vmul.f32 %v1096_v52, %v254_v39  ;;  %v583_v39 = vld [vmem:[#allocation4 + $0x28] sm:$0xff] }
 0x6cb   :  { %v352_v53 = vpop.permute.xlu1 %351 }
 0x6cc   :  { %v354_v54 = vmul.f32 %v1096_v52, %v352_v53 }
 0x6ce   :  { %356 = vrot.lane.b32.xlu0 %v354_v54, %s1212_s1 }
 0x740   :  { %v357_v56 = vpop.permute.xlu0 %356 }
 0x741   :  { %v359_v57 = vadd.f32 %v357_v56, %v349_v55 }
 0x743   :  { %1097 = vtanh.f32 %v359_v57 }
 0x750   :  { %v1098_v58 = vpop.eup %1097 }
 0x751   :  { %362 = vrot.lane.b32.xlu1 %v1098_v58, %s1211_s0 }
 0x7c3   :  { %v363_v59 = vpop.permute.xlu1 %362 }
 0x7c4   :  { %v365_v60 = vmul.f32 %v1096_v52, %v363_v59  ;;  %v688_v52 = vld [vmem:[#allocation4 + $0x30] sm:$0xff] }
 0x7c6   :  { %367 = vrot.lane.b32.xlu0 %v365_v60, %s1212_s1 }
 0x838   :  { %v368_v61 = vpop.permute.xlu0 %367 }
 0x839   :  { %371 = vst.msk [vmem:[#allocation9 + $0x10] sm:$0xff] %vm44_vm0, %v368_v61  ;;  %1019 = vmatmul.mubr.msk.f32.vlgmr.msra.gmra.mxu1 %vm44_vm0, %v368_v61 }
 0x83a   :  { %1033 = vmatpush3.msra.mxu1 %v1252_v1  ;;  %1040 = vmatprep.mubr.msk.f32.mxu1 %vm1210_vm1, %v1209_v0 }
 0x83b   :  { %1034 = vmatprep.subr.mxu1 %v1209_v0 }
 0x83c   :  { %1035 = vmatpush3.msra.mxu1 %v1254_v2 }
 0x83d   :  { %1036 = vmatprep.subr.mxu1 %v1209_v0 }
 0x83e   :  { %1037 = vmatpush3.msra.mxu1 %v1259_v3 }
 0x83f   :  { %1038 = vmatprep.subr.mxu1 %v1209_v0 }
 0x840   :  { %1039 = vmatpush3.msra.mxu1 %v1265_v4 }
 0x841   :  { %1054 = vmatprep.subr.mxu1 %v1209_v0 }
 0x8f9   :  { %v442_v63 = vpop.f32.mrf.mxu1 }
 0x8fa   :  { %v446_v5 = vadd.f32 %v442_v63, %v373_v62 }
 0x8fb   :  { %v1020_v6 = vpop.f32.mrf.mxu1 }
 0x8fc   :  { %1099 = vtanh.f32 %v446_v5  ;;  %v928_v8 = vmul.f32 -1.442695, %v446_v5 }
 0x8fe   :  { %1101 = vpow2.f32 %v928_v8 }
 0x909   :  { %v1100_v7 = vpop.eup %1099 }
 0x90a   :  { %456 = vrot.lane.b32.xlu1 %v1100_v7, %s1211_s0 }
 0x90b   :  { %v1102_v9 = vpop.eup %1101 }
 0x90c   :  { %v450_v10 = vadd.f32 1.0, %v1102_v9 }
 0x90e   :  { %1103 = vrcp.f32 %v450_v10 }
 0x91b   :  { %v1104_v11 = vpop.eup %1103 }
 0x91c   :  { %v454_v14 = vmul.f32 %v1104_v11, %v359_v57 }
 0x97c   :  { %v457_v12 = vpop.permute.xlu1 %456 }
 0x97d   :  { %v459_v13 = vmul.f32 %v1104_v11, %v457_v12 }
 0x97f   :  { %461 = vrot.lane.b32.xlu0 %v459_v13, %s1212_s1 }
 0x9f1   :  { %v462_v15 = vpop.permute.xlu0 %461 }
 0x9f2   :  { %v464_v16 = vadd.f32 %v462_v15, %v454_v14 }
 0x9f4   :  { %1105 = vtanh.f32 %v464_v16 }
 0xa01   :  { %v1106_v17 = vpop.eup %1105 }
 0xa02   :  { %467 = vrot.lane.b32.xlu1 %v1106_v17, %s1211_s0 }
 0xa74   :  { %v468_v18 = vpop.permute.xlu1 %467 }
 0xa75   :  { %v470_v19 = vmul.f32 %v1104_v11, %v468_v18  ;;  %v793_v11 = vld [vmem:[#allocation4 + $0x38] sm:$0xff] }
 0xa77   :  { %472 = vrot.lane.b32.xlu0 %v470_v19, %s1212_s1 }
 0xae9   :  { %v473_v20 = vpop.permute.xlu0 %472 }
 0xaea   :  { %476 = vst.msk [vmem:[#allocation9 + $0x18] sm:$0xff] %vm44_vm0, %v473_v20  ;;  %1030 = vmatmul.mubr.msk.f32.vlgmr.msra.gmra.mxu0 %vm44_vm0, %v473_v20 }
 0xaeb   :  { %1044 = vmatpush3.msra.mxu0 %v1252_v1  ;;  %1051 = vmatprep.mubr.msk.f32.mxu0 %vm1210_vm1, %v1209_v0 }
 0xaec   :  { %1045 = vmatprep.subr.mxu0 %v1209_v0 }
 0xaed   :  { %1046 = vmatpush3.msra.mxu0 %v1254_v2 }
 0xaee   :  { %1047 = vmatprep.subr.mxu0 %v1209_v0 }
 0xaef   :  { %1048 = vmatpush3.msra.mxu0 %v1259_v3 }
 0xaf0   :  { %1049 = vmatprep.subr.mxu0 %v1209_v0 }
 0xaf1   :  { %1050 = vmatpush3.msra.mxu0 %v1265_v4 }
 0xbaa   :  { %v547_v22 = vpop.f32.mrf.mxu0 }
 0xbab   :  { %v551_v23 = vadd.f32 %v547_v22, %v478_v21 }
 0xbac   :  { %v1031_v24 = vpop.f32.mrf.mxu0 }
 0xbad   :  { %1107 = vtanh.f32 %v551_v23  ;;  %v930_v26 = vmul.f32 -1.442695, %v551_v23 }
 0xbaf   :  { %1109 = vpow2.f32 %v930_v26 }
 0xbba   :  { %v1108_v25 = vpop.eup %1107 }
 0xbbb   :  { %561 = vrot.lane.b32.xlu1 %v1108_v25, %s1211_s0 }
 0xbbc   :  { %v1110_v27 = vpop.eup %1109 }
 0xbbd   :  { %v555_v28 = vadd.f32 1.0, %v1110_v27 }
 0xbbf   :  { %1111 = vrcp.f32 %v555_v28 }
 0xbcc   :  { %v1112_v29 = vpop.eup %1111 }
 0xbcd   :  { %v559_v32 = vmul.f32 %v1112_v29, %v464_v16 }
 0xc2d   :  { %v562_v30 = vpop.permute.xlu1 %561 }
 0xc2e   :  { %v564_v31 = vmul.f32 %v1112_v29, %v562_v30 }
 0xc30   :  { %566 = vrot.lane.b32.xlu0 %v564_v31, %s1212_s1 }
 0xca2   :  { %v567_v33 = vpop.permute.xlu0 %566 }
 0xca3   :  { %v569_v34 = vadd.f32 %v567_v33, %v559_v32 }
 0xca5   :  { %1113 = vtanh.f32 %v569_v34 }
 0xcb2   :  { %v1114_v35 = vpop.eup %1113 }
 0xcb3   :  { %572 = vrot.lane.b32.xlu1 %v1114_v35, %s1211_s0 }
 0xd25   :  { %v573_v36 = vpop.permute.xlu1 %572 }
 0xd26   :  { %v575_v37 = vmul.f32 %v1112_v29, %v573_v36 }
 0xd28   :  { %577 = vrot.lane.b32.xlu0 %v575_v37, %s1212_s1 }
 0xd9a   :  { %v578_v38 = vpop.permute.xlu0 %577 }
 0xd9b   :  { %581 = vst.msk [vmem:[#allocation9 + $0x20] sm:$0xff] %vm44_vm0, %v578_v38  ;;  %1041 = vmatmul.mubr.msk.f32.vlgmr.msra.gmra.mxu1 %vm44_vm0, %v578_v38 }
 0xd9c   :  { %1055 = vmatpush3.msra.mxu1 %v1252_v1  ;;  %1062 = vmatprep.mubr.msk.f32.mxu1 %vm1210_vm1, %v1209_v0 }
 0xd9d   :  { %1056 = vmatprep.subr.mxu1 %v1209_v0 }
 0xd9e   :  { %1057 = vmatpush3.msra.mxu1 %v1254_v2 }
 0xd9f   :  { %1058 = vmatprep.subr.mxu1 %v1209_v0 }
 0xda0   :  { %1059 = vmatpush3.msra.mxu1 %v1259_v3 }
 0xda1   :  { %1060 = vmatprep.subr.mxu1 %v1209_v0 }
 0xda2   :  { %1061 = vmatpush3.msra.mxu1 %v1265_v4 }
 0xe5b   :  { %v652_v40 = vpop.f32.mrf.mxu1 }
 0xe5c   :  { %v656_v41 = vadd.f32 %v652_v40, %v583_v39 }
 0xe5d   :  { %v1042_v42 = vpop.f32.mrf.mxu1 }
 0xe5e   :  { %1115 = vtanh.f32 %v656_v41  ;;  %v932_v43 = vmul.f32 -1.442695, %v656_v41 }
 0xe60   :  { %1117 = vpow2.f32 %v932_v43 }
 0xe6b   :  { %v1116_v1 = vpop.eup %1115 }
 0xe6c   :  { %666 = vrot.lane.b32.xlu1 %v1116_v1, %s1211_s0 }
 0xe6d   :  { %v1118_v44 = vpop.eup %1117 }
 0xe6e   :  { %v660_v2 = vadd.f32 1.0, %v1118_v44 }
 0xe70   :  { %1119 = vrcp.f32 %v660_v2 }
 0xe7d   :  { %v1120_v45 = vpop.eup %1119 }
 0xe7e   :  { %v664_v0 = vmul.f32 %v1120_v45, %v569_v34 }
 0xede   :  { %v667_v46 = vpop.permute.xlu1 %666 }
 0xedf   :  { %v669_v3 = vmul.f32 %v1120_v45, %v667_v46 }
 0xee1   :  { %671 = vrot.lane.b32.xlu0 %v669_v3, %s1212_s1 }
 0xf53   :  { %v672_v4 = vpop.permute.xlu0 %671 }
 0xf54   :  { %v674_v47 = vadd.f32 %v672_v4, %v664_v0 }
 0xf56   :  { %1121 = vtanh.f32 %v674_v47 }
 0xf63   :  { %v1122_v48 = vpop.eup %1121 }
 0xf64   :  { %677 = vrot.lane.b32.xlu1 %v1122_v48, %s1211_s0 }
 0xfd6   :  { %v678_v49 = vpop.permute.xlu1 %677 }
 0xfd7   :  { %v680_v50 = vmul.f32 %v1120_v45, %v678_v49 }
 0xfd9   :  { %682 = vrot.lane.b32.xlu0 %v680_v50, %s1212_s1 }
0x104b   :  { %v683_v51 = vpop.permute.xlu0 %682 }
0x104c   :  { %686 = vst.msk [vmem:[#allocation9 + $0x28] sm:$0xff] %vm44_vm0, %v683_v51  ;;  %1052 = vmatmul.mubr.msk.f32.vlgmr.msra.gmra.mxu0 %vm44_vm0, %v683_v51 }
0x110c   :  { %v757_v53 = vpop.f32.mrf.mxu0 }
0x110d   :  { %v761_v54 = vadd.f32 %v757_v53, %v688_v52 }
0x110e   :  { %v1053_v55 = vpop.f32.mrf.mxu0 }
0x110f   :  { %1123 = vtanh.f32 %v761_v54  ;;  %v934_v57 = vmul.f32 -1.442695, %v761_v54 }
0x1111   :  { %1125 = vpow2.f32 %v934_v57 }
0x111c   :  { %v1124_v56 = vpop.eup %1123 }
0x111d   :  { %771 = vrot.lane.b32.xlu1 %v1124_v56, %s1211_s0 }
0x111e   :  { %v1126_v58 = vpop.eup %1125 }
0x111f   :  { %v765_v59 = vadd.f32 1.0, %v1126_v58 }
0x1121   :  { %1127 = vrcp.f32 %v765_v59 }
0x112e   :  { %v1128_v60 = vpop.eup %1127 }
0x112f   :  { %v769_v63 = vmul.f32 %v1128_v60, %v674_v47 }
0x118f   :  { %v772_v61 = vpop.permute.xlu1 %771 }
0x1190   :  { %v774_v62 = vmul.f32 %v1128_v60, %v772_v61 }
0x1192   :  { %776 = vrot.lane.b32.xlu0 %v774_v62, %s1212_s1 }
0x1204   :  { %v777_v5 = vpop.permute.xlu0 %776 }
0x1205   :  { %v779_v6 = vadd.f32 %v777_v5, %v769_v63 }
0x1207   :  { %1129 = vtanh.f32 %v779_v6 }
0x1214   :  { %v1130_v7 = vpop.eup %1129 }
0x1215   :  { %782 = vrot.lane.b32.xlu1 %v1130_v7, %s1211_s0 }
0x1287   :  { %v783_v8 = vpop.permute.xlu1 %782 }
0x1288   :  { %v785_v9 = vmul.f32 %v1128_v60, %v783_v8 }
0x128a   :  { %787 = vrot.lane.b32.xlu0 %v785_v9, %s1212_s1 }
0x12fc   :  { %v788_v10 = vpop.permute.xlu0 %787 }
0x12fd   :  { %791 = vst.msk [vmem:[#allocation9 + $0x30] sm:$0xff] %vm44_vm0, %v788_v10  ;;  %1063 = vmatmul.mubr.msk.f32.vlgmr.msra.gmra.mxu1 %vm44_vm0, %v788_v10 }
0x13bd   :  { %v862_v12 = vpop.f32.mrf.mxu1 }
0x13be   :  { %v866_v13 = vadd.f32 %v862_v12, %v793_v11 }
0x13bf   :  { %v1064_v14 = vpop.f32.mrf.mxu1 }
0x13c0   :  { %1131 = vtanh.f32 %v866_v13  ;;  %v936_v16 = vmul.f32 -1.442695, %v866_v13 }
0x13c2   :  { %1133 = vpow2.f32 %v936_v16 }
0x13cd   :  { %v1132_v15 = vpop.eup %1131 }
0x13ce   :  { %876 = vrot.lane.b32.xlu1 %v1132_v15, %s1211_s0 }
0x13cf   :  { %v1134_v17 = vpop.eup %1133 }
0x13d0   :  { %v870_v18 = vadd.f32 1.0, %v1134_v17 }
0x13d2   :  { %1135 = vrcp.f32 %v870_v18 }
0x13df   :  { %v1136_v19 = vpop.eup %1135 }
0x13e0   :  { %v874_v22 = vmul.f32 %v1136_v19, %v779_v6 }
0x1440   :  { %v877_v20 = vpop.permute.xlu1 %876 }
0x1441   :  { %v879_v21 = vmul.f32 %v1136_v19, %v877_v20 }
0x1443   :  { %881 = vrot.lane.b32.xlu0 %v879_v21, %s1212_s1 }
0x14b5   :  { %v882_v23 = vpop.permute.xlu0 %881 }
0x14b6   :  { %v884_v24 = vadd.f32 %v882_v23, %v874_v22 }
0x14b8   :  { %1137 = vtanh.f32 %v884_v24 }
0x14c5   :  { %v1138_v25 = vpop.eup %1137 }
0x14c6   :  { %887 = vrot.lane.b32.xlu1 %v1138_v25, %s1211_s0 }
0x14ca   :  { %899 = vrot.lane.b32.xlu1 %v884_v24, %s1213_s21 }
0x1538   :  { %v888_v26 = vpop.permute.xlu1 %887 }
0x1539   :  { %v890_v27 = vmul.f32 %v1136_v19, %v888_v26 }
0x153b   :  { %892 = vrot.lane.b32.xlu0 %v890_v27, %s1212_s1 }
0x153c   :  { %v900_v28 = vpop.permute.xlu1 %899 }
0x153d   :  { %902 = vst.msk [vmem:[#allocation3] sm:$0xff] %vm44_vm0, %v900_v28 }
0x15ad   :  { %v893_v29 = vpop.permute.xlu0 %892 }
0x15ae   :  { %896 = vst.msk [vmem:[#allocation9 + $0x38] sm:$0xff] %vm44_vm0, %v893_v29  ;;  %897 = vst.msk [vmem:[#allocation2] sm:$0xff] %vm44_vm0, %v893_v29 }
0x15af   :  { %1190 = shalt.err (!%p1187_p0)
}
0x15b0   :  { %914 = dma.vmem_to_hbm [thread:$0]  %s909_s23, 1024, %s1393_s2, [#allocation6], %s1206_s12, %s1206_s12, %s1207_s13  }
0x15b1   :  { %1203 = dma.done.wait [#allocation6], 1024  }
0x15b2   :  { %1204 = vsyncadd [#allocation6], 4294966272 }
0x15b3   :  { %918 = vsyncpa [#allocation5], 1 }
0x15b4   :  { %919 = vsyncpa [#allocation8], 1 }
0x15b5   :  { %920 = vsyncpa [#allocation6], 1 }

</bundles_post_ra>
